<compile_context>
chip_gen: v7x
topology: tpu7x:2x2x1
jax: 0.10.0
libtpu: 0.0.40
codegen_flags: <defaults>
</compile_context>

<pallas_src>
import functools

import jax
import jax.numpy as jnp
from jax.experimental import pallas as pl
from jax.experimental.pallas import tpu as pltpu


def _layernorm(x, w, b, eps=1e-5):
    # One-pass moments: var = E[x^2] - E[x]^2 (halves cross-lane reductions).
    m = jnp.mean(x, axis=-1, keepdims=True)
    m2 = jnp.mean(x * x, axis=-1, keepdims=True)
    var = jnp.maximum(m2 - m * m, 0.0)
    return (x - m) * jax.lax.rsqrt(var + eps) * w + b


def encoder_layer_kernel(x_ref, pos_ref,
                         wqk_ref, bqk_ref, wv_ref, bv_ref,
                         wo_ref, bo_ref,
                         ln1_w_ref, ln1_b_ref,
                         w1_ref, b1_ref, w2_ref, b2_ref,
                         ln2_w_ref, ln2_b_ref,
                         o_ref, *, nhead):
    Bt, S, D = x_ref.shape
    hd = D // nhead
    cdt = wqk_ref.dtype                       # bf16 compute dtype for MXU operands

    x = x_ref[...].astype(jnp.float32)        # (Bt, S, D)
    pos = pos_ref[...].astype(jnp.float32)

    x2 = x.reshape(Bt * S, D)                 # flatten batch+seq into GEMM M dim
    x2_cd = x2.astype(cdt)                    # cast activations to compute dtype once
    qk_in_cd = (x + pos).reshape(Bt * S, D).astype(cdt)   # with_pos_embed(src, pos)

    # Fused Q,K projection (N = 2D) + V projection.  Scale is pre-folded into Wq/bq.
    qk = jnp.dot(qk_in_cd, wqk_ref[...],
                 preferred_element_type=jnp.float32) + bqk_ref[...]        # (Bt*S, 2D)
    v = jnp.dot(x2_cd, wv_ref[...],
                preferred_element_type=jnp.float32) + bv_ref[...]          # (Bt*S, D)

    q3 = qk[:, 0:D].reshape(Bt, S, D).astype(cdt)
    k3 = qk[:, D:2 * D].reshape(Bt, S, D).astype(cdt)
    v3 = v.reshape(Bt, S, D).astype(cdt)

    def split_heads(t3):
        # O(nhead) lane slices batched over (Bt, S); heads become the leading batch
        # axis so every per-head matmul runs inside one batched einsum.
        return jnp.concatenate(
            [t3[:, :, h * hd:(h + 1) * hd] for h in range(nhead)], axis=0)  # (nhead*Bt, S, hd)

    qh = split_heads(q3)
    kh = split_heads(k3)
    vh = split_heads(v3)

    # Batched-head attention: single dot_general per stage over batch = nhead*Bt.
    scores = jnp.einsum('bqd,bkd->bqk', qh, kh,
                        preferred_element_type=jnp.float32)                # (nhead*Bt, S, S)
    scores = scores - jnp.max(scores, axis=-1, keepdims=True)
    p32 = jnp.exp(scores)                                                  # f32 exp (v5e-safe)
    denom = jnp.sum(p32, axis=-1, keepdims=True)                           # (nhead*Bt, S, 1)
    ctx = jnp.einsum('bqk,bkd->bqd', p32.astype(cdt), vh,
                     preferred_element_type=jnp.float32)                   # (nhead*Bt, S, hd)
    # Deferred softmax normalization: scale the (S, hd) context, not the (S, S) probs.
    ctx = ctx * pl.reciprocal(denom, approx=True)

    # Merge heads back to (Bt*S, D): nhead leading-axis slices + one lane concat.
    ctx2 = jnp.concatenate(
        [ctx[h * Bt:(h + 1) * Bt] for h in range(nhead)], axis=-1).reshape(Bt * S, D)

    attn_out = jnp.dot(ctx2.astype(cdt), wo_ref[...],
                       preferred_element_type=jnp.float32) + bo_ref[...]

    # Residual + LayerNorm1 (f32)
    src = _layernorm(x2 + attn_out, ln1_w_ref[...], ln1_b_ref[...])

    # FFN
    h1 = jnp.dot(src.astype(cdt), w1_ref[...],
                 preferred_element_type=jnp.float32) + b1_ref[...]
    h1 = jnp.maximum(h1, 0.0)                                              # ReLU
    ff = jnp.dot(h1.astype(cdt), w2_ref[...],
                 preferred_element_type=jnp.float32) + b2_ref[...]

    # Residual + LayerNorm2 (f32)
    out = _layernorm(src + ff, ln2_w_ref[...], ln2_b_ref[...])

    o_ref[...] = out.reshape(Bt, S, D).astype(o_ref.dtype)


# ----------------------------------------------------------------------------- wrapper / tiling


def _tpu_defaults():
    """Best-effort generation query: (physical VMEM bytes, target GEMM rows)."""
    vmem_cap = 128 * 1024 * 1024
    target_rows = 256                         # v6e/v7x MXU is 256-wide
    try:
        info = pltpu.get_tpu_info()
        vmem_cap = int(getattr(info, "vmem_capacity_bytes", vmem_cap))
        name = str(getattr(info, "chip_version", "")).lower()
        if "5" in name:                       # v5e MXU is 128x128: M=128 already fills it
            target_rows = 128
    except Exception:
        pass
    return vmem_cap, target_rows


def _block_vmem_bytes(bt, S, D, FF, nhead, act_bytes=4, cdt_bytes=2):
    """Rough per-grid-step VMEM estimate (I/O blocks double-buffered, weights, attention)."""
    rows = bt * S
    io = 2 * 3 * rows * D * act_bytes                                   # x / pos / out blocks
    weights = 2 * cdt_bytes * (2 * D * D + D * D + D * D + D * FF + FF * D)
    acts = act_bytes * rows * (2 * D + D + 3 * D + FF + 2 * D)          # qk, v, heads, h1, src/ff
    attn = bt * nhead * S * S * (act_bytes + act_bytes + cdt_bytes)     # scores + exp + bf16 probs
    return io + weights + acts + attn


def _pick_block_b(B, S, D, FF, nhead, target_rows, vmem_budget):
    """Largest batch-divisor whose block fits the VMEM budget and keeps Bt*S near target_rows.

    Prefers >=2 grid steps so the 'parallel' batch axis can shard across v7x's two TensorCores.
    """
    divs = [d for d in range(1, B + 1) if B % d == 0]
    feasible = [d for d in divs
                if d * S <= max(S, target_rows)
                and _block_vmem_bytes(d, S, D, FF, nhead) <= vmem_budget]
    if not feasible:
        return 1
    multi = [d for d in feasible if B // d >= 2]
    return max(multi) if multi else max(feasible)


def _cost_estimate(B, S, D, FF, nhead):
    rows = B * S
    hd = D // nhead
    gemm_flops = 2 * rows * (2 * D * D + D * D + D * D + D * FF + FF * D)
    attn_flops = 2 * 2 * B * nhead * S * S * hd
    transcendentals = B * nhead * S * S + 2 * rows
    bytes_accessed = (3 * rows * D * 4
                      + 2 * (2 * D * D + 2 * D * D + 2 * D * FF)
                      + 4 * (8 * D + FF))
    return pl.CostEstimate(flops=int(gemm_flops + attn_flops),
                           transcendentals=int(transcendentals),
                           bytes_accessed=int(bytes_accessed))


def _full_spec(shape):
    nd = len(shape)
    return pl.BlockSpec(shape, lambda b: (0,) * nd)


def encoder_layer_apply(x_bsd, pos_bsd, kparams, nhead, block_b=None):
    B, S, D = x_bsd.shape
    FF = kparams[8].shape[1]                     # w1 is (D, FF)

    vmem_cap, target_rows = _tpu_defaults()
    # ~96 MiB on 128-MiB chips (v5e/v6e), ~48 MiB on v7x's 64 MiB.
    vmem_limit = int(min(max(vmem_cap * 3 // 4, 32 * 1024 * 1024), 100 * 1024 * 1024))

    if block_b is None:
        block_b = _pick_block_b(B, S, D, FF, nhead, target_rows,
                                int(vmem_limit * 0.8))
    assert B % block_b == 0

    in_specs = [
        pl.BlockSpec((block_b, S, D), lambda b: (b, 0, 0)),   # x
        pl.BlockSpec((block_b, S, D), lambda b: (b, 0, 0)),   # pos
    ] + [_full_spec(p.shape) for p in kparams]

    return pl.pallas_call(
        functools.partial(encoder_layer_kernel, nhead=nhead),
        out_shape=jax.ShapeDtypeStruct((B, S, D), x_bsd.dtype),
        grid=(B // block_b,),
        in_specs=in_specs,
        out_specs=pl.BlockSpec((block_b, S, D), lambda b: (b, 0, 0)),
        compiler_params=pltpu.CompilerParams(
            dimension_semantics=("parallel",),
            vmem_limit_bytes=vmem_limit),
        cost_estimate=_cost_estimate(B, S, D, FF, nhead),
    )(x_bsd, pos_bsd, *kparams)


# ----------------------------------------------------------------------------- parameter prep


def _prep_layer_params(params, nhead, compute_dtype=jnp.bfloat16):
    """PyTorch-layout params -> kernel layout (pre-transposed, QK-fused, scale folded, bf16)."""
    (in_w, in_b, out_w, out_b, ln1_w, ln1_b,
     ff1_w, ff1_b, ff2_w, ff2_b, ln2_w, ln2_b) = params
    D = out_w.shape[0]
    hd = D // nhead
    scale = 1.0 / float(hd) ** 0.5

    in_b = in_b.reshape(1, 3 * D).astype(jnp.float32)
    wq_t = in_w[0:D, :].T.astype(jnp.float32) * scale        # fold 1/sqrt(hd) into Wq
    wk_t = in_w[D:2 * D, :].T.astype(jnp.float32)
    wqk = jnp.concatenate([wq_t, wk_t], axis=1).astype(compute_dtype)      # (D, 2D)
    bqk = jnp.concatenate([in_b[:, 0:D] * scale, in_b[:, D:2 * D]], axis=1)

    wv = in_w[2 * D:3 * D, :].T.astype(compute_dtype)                      # (D, D)
    bv = in_b[:, 2 * D:3 * D]

    wo = out_w.T.astype(compute_dtype)                                     # (D, D)
    bo = out_b.reshape(1, D).astype(jnp.float32)

    w1 = ff1_w.T.astype(compute_dtype)                                     # (D, FF)
    b1 = ff1_b.reshape(1, -1).astype(jnp.float32)
    w2 = ff2_w.T.astype(compute_dtype)                                     # (FF, D)
    b2 = ff2_b.reshape(1, D).astype(jnp.float32)

    return [wqk, bqk, wv, bv, wo, bo,
            ln1_w.reshape(1, D).astype(jnp.float32), ln1_b.reshape(1, D).astype(jnp.float32),
            w1, b1, w2, b2,
            ln2_w.reshape(1, D).astype(jnp.float32), ln2_b.reshape(1, D).astype(jnp.float32)]


def prepare_encoder_params(layer_params, nhead, compute_dtype=jnp.bfloat16):
    """Hoisted weight prep: call once, reuse across forwards (review item: prep was per-forward)."""
    return [_prep_layer_params(p, nhead, compute_dtype) for p in layer_params]


def transformer_encoder(src_sbd, prepped_layer_params, nhead, pos_sbd=None, norm_params=None,
                        block_b=None):
    """Matches TransformerEncoder.forward(src, mask=None, src_key_padding_mask=None, pos=pos).

    src_sbd / pos_sbd: (S, B, D) as in PyTorch nn.MultiheadAttention (batch_first=False).
    prepped_layer_params: output of prepare_encoder_params.
    """
    x = jnp.transpose(src_sbd, (1, 0, 2))      # -> (B, S, D)
    if pos_sbd is None:
        pos = jnp.zeros_like(x)
    else:
        pos = jnp.transpose(pos_sbd, (1, 0, 2))
    for kparams in prepped_layer_params:
        x = encoder_layer_apply(x, pos, kparams, nhead, block_b=block_b)
    if norm_params is not None:                # self.norm (None for normalize_before=False)
        w, b = norm_params
        x = _layernorm(x, w, b)
    return jnp.transpose(x, (1, 0, 2))         # back to (S, B, D)


def init_layer_params(key, d_model, dim_ff):
    """PyTorch-convention parameter shapes (in_proj_weight (3D,D), etc.)."""
    ks = jax.random.split(key, 8)
    s = 0.05
    in_w = jax.random.normal(ks[0], (3 * d_model, d_model), jnp.float32) * s
    in_b = jax.random.normal(ks[1], (3 * d_model,), jnp.float32) * s
    out_w = jax.random.normal(ks[2], (d_model, d_model), jnp.float32) * s
    out_b = jax.random.normal(ks[3], (d_model,), jnp.float32) * s
    ln1_w = jnp.ones((d_model,), jnp.float32)
    ln1_b = jnp.zeros((d_model,), jnp.float32)
    ff1_w = jax.random.normal(ks[4], (dim_ff, d_model), jnp.float32) * s
    ff1_b = jax.random.normal(ks[5], (dim_ff,), jnp.float32) * s
    ff2_w = jax.random.normal(ks[6], (d_model, dim_ff), jnp.float32) * s
    ff2_b = jax.random.normal(ks[7], (d_model,), jnp.float32) * s
    ln2_w = jnp.ones((d_model,), jnp.float32)
    ln2_b = jnp.zeros((d_model,), jnp.float32)
    return [in_w, in_b, out_w, out_b, ln1_w, ln1_b,
            ff1_w, ff1_b, ff2_w, ff2_b, ln2_w, ln2_b]


if __name__ == "__main__":
    S, B, D = 8, 2, 32          # seq, batch, d_model
    NHEAD = 4
    DIM_FF = 64
    NUM_LAYERS = 2

    root = jax.random.PRNGKey(0)
    k_src, k_pos, k_params = jax.random.split(root, 3)

    src = jax.random.normal(k_src, (S, B, D), jnp.float32)
    pos = jax.random.normal(k_pos, (S, B, D), jnp.float32)

    layer_keys = jax.random.split(k_params, NUM_LAYERS)
    layer_params = [init_layer_params(k, D, DIM_FF) for k in layer_keys]

    # Weight prep hoisted out of the forward path; forward itself is jitted.
    prepped = prepare_encoder_params(layer_params, NHEAD)

    @jax.jit
    def fwd(src_sbd, pos_sbd, kparams_all):
        return transformer_encoder(src_sbd, kparams_all, NHEAD, pos_sbd=pos_sbd,
                                   norm_params=None)

    out = jax.block_until_ready(fwd(src, pos, prepped))

    assert out.shape == (S, B, D), out.shape
    assert bool(jnp.all(jnp.isfinite(out)))
    print("KERNEL_OK")
</pallas_src>

<mosaic_0001>
module attributes {stable_mosaic.version = 11 : i64} {
  func.func @encoder_layer_kernel(%arg0: i32, %arg1: memref<1x8x32xf32, #tpu.memory_space<vmem>>, %arg2: memref<1x8x32xf32, #tpu.memory_space<vmem>>, %arg3: memref<32x64xbf16, #tpu.memory_space<vmem>>, %arg4: memref<1x64xf32, #tpu.memory_space<vmem>>, %arg5: memref<32x32xbf16, #tpu.memory_space<vmem>>, %arg6: memref<1x32xf32, #tpu.memory_space<vmem>>, %arg7: memref<32x32xbf16, #tpu.memory_space<vmem>>, %arg8: memref<1x32xf32, #tpu.memory_space<vmem>>, %arg9: memref<1x32xf32, #tpu.memory_space<vmem>>, %arg10: memref<1x32xf32, #tpu.memory_space<vmem>>, %arg11: memref<32x64xbf16, #tpu.memory_space<vmem>>, %arg12: memref<1x64xf32, #tpu.memory_space<vmem>>, %arg13: memref<64x32xbf16, #tpu.memory_space<vmem>>, %arg14: memref<1x32xf32, #tpu.memory_space<vmem>>, %arg15: memref<1x32xf32, #tpu.memory_space<vmem>>, %arg16: memref<1x32xf32, #tpu.memory_space<vmem>>, %arg17: memref<1x8x32xf32, #tpu.memory_space<vmem>>) attributes {dimension_semantics = [#tpu.dimension_semantics<parallel>], iteration_bounds = array<i64: 2>, scalar_prefetch = 0 : i64, scratch_operands = 0 : i64, tpu.core_type = #tpu.core_type<tc>, window_params = [{transform_indices = @transform_0, window_bounds = array<i64: 1, 8, 32>}, {transform_indices = @transform_1, window_bounds = array<i64: 1, 8, 32>}, {pipeline_mode = #tpu.pipeline_mode<synchronous>, transform_indices = @transform_2, window_bounds = array<i64: 32, 64>}, {pipeline_mode = #tpu.pipeline_mode<synchronous>, transform_indices = @transform_3, window_bounds = array<i64: 1, 64>}, {pipeline_mode = #tpu.pipeline_mode<synchronous>, transform_indices = @transform_4, window_bounds = array<i64: 32, 32>}, {pipeline_mode = #tpu.pipeline_mode<synchronous>, transform_indices = @transform_5, window_bounds = array<i64: 1, 32>}, {pipeline_mode = #tpu.pipeline_mode<synchronous>, transform_indices = @transform_6, window_bounds = array<i64: 32, 32>}, {pipeline_mode = #tpu.pipeline_mode<synchronous>, transform_indices = @transform_7, window_bounds = array<i64: 1, 32>}, {pipeline_mode = #tpu.pipeline_mode<synchronous>, transform_indices = @transform_8, window_bounds = array<i64: 1, 32>}, {pipeline_mode = #tpu.pipeline_mode<synchronous>, transform_indices = @transform_9, window_bounds = array<i64: 1, 32>}, {pipeline_mode = #tpu.pipeline_mode<synchronous>, transform_indices = @transform_10, window_bounds = array<i64: 32, 64>}, {pipeline_mode = #tpu.pipeline_mode<synchronous>, transform_indices = @transform_11, window_bounds = array<i64: 1, 64>}, {pipeline_mode = #tpu.pipeline_mode<synchronous>, transform_indices = @transform_12, window_bounds = array<i64: 64, 32>}, {pipeline_mode = #tpu.pipeline_mode<synchronous>, transform_indices = @transform_13, window_bounds = array<i64: 1, 32>}, {pipeline_mode = #tpu.pipeline_mode<synchronous>, transform_indices = @transform_14, window_bounds = array<i64: 1, 32>}, {pipeline_mode = #tpu.pipeline_mode<synchronous>, transform_indices = @transform_15, window_bounds = array<i64: 1, 32>}, {transform_indices = @transform_16, window_bounds = array<i64: 1, 8, 32>}]} {
    %c0 = arith.constant 0 : index
    %c0_0 = arith.constant 0 : index
    %c0_1 = arith.constant 0 : index
    %0 = vector.load %arg1[%c0, %c0_0, %c0_1] : memref<1x8x32xf32, #tpu.memory_space<vmem>>, vector<1x8x32xf32>
    %c0_2 = arith.constant 0 : index
    %c0_3 = arith.constant 0 : index
    %c0_4 = arith.constant 0 : index
    %1 = vector.load %arg2[%c0_2, %c0_3, %c0_4] : memref<1x8x32xf32, #tpu.memory_space<vmem>>, vector<1x8x32xf32>
    %2 = vector.shape_cast %0 : vector<1x8x32xf32> to vector<8x32xf32>
    %3 = arith.truncf %2 : vector<8x32xf32> to vector<8x32xbf16>
    %4 = arith.addf %0, %1 : vector<1x8x32xf32>
    %5 = vector.shape_cast %4 : vector<1x8x32xf32> to vector<8x32xf32>
    %6 = arith.truncf %5 : vector<8x32xf32> to vector<8x32xbf16>
    %c0_5 = arith.constant 0 : index
    %c0_6 = arith.constant 0 : index
    %7 = vector.load %arg3[%c0_5, %c0_6] : memref<32x64xbf16, #tpu.memory_space<vmem>>, vector<32x64xbf16>
    %cst = arith.constant dense<0.000000e+00> : vector<8x64xf32>
    %8 = tpu.matmul %6, %7, %cst {dimension_numbers = #tpu.dot_dimension_numbers<[1], [0], [0], [1], [0, 0, 1, 1], [], []>} : vector<8x32xbf16>, vector<32x64xbf16>, vector<8x64xf32> -> vector<8x64xf32>
    %c0_7 = arith.constant 0 : index
    %c0_8 = arith.constant 0 : index
    %9 = vector.load %arg4[%c0_7, %c0_8] : memref<1x64xf32, #tpu.memory_space<vmem>>, vector<1x64xf32>
    %10 = vector.broadcast %9 : vector<1x64xf32> to vector<8x64xf32>
    %11 = arith.addf %8, %10 : vector<8x64xf32>
    %c0_9 = arith.constant 0 : index
    %c0_10 = arith.constant 0 : index
    %12 = vector.load %arg5[%c0_9, %c0_10] : memref<32x32xbf16, #tpu.memory_space<vmem>>, vector<32x32xbf16>
    %cst_11 = arith.constant dense<0.000000e+00> : vector<8x32xf32>
    %13 = tpu.matmul %3, %12, %cst_11 {dimension_numbers = #tpu.dot_dimension_numbers<[1], [0], [0], [1], [0, 0, 1, 1], [], []>} : vector<8x32xbf16>, vector<32x32xbf16>, vector<8x32xf32> -> vector<8x32xf32>
    %c0_12 = arith.constant 0 : index
    %c0_13 = arith.constant 0 : index
    %14 = vector.load %arg6[%c0_12, %c0_13] : memref<1x32xf32, #tpu.memory_space<vmem>>, vector<1x32xf32>
    %15 = vector.broadcast %14 : vector<1x32xf32> to vector<8x32xf32>
    %16 = arith.addf %13, %15 : vector<8x32xf32>
    %17 = vector.extract_strided_slice %11 {offsets = [0, 0], sizes = [8, 32], strides = [1, 1]} : vector<8x64xf32> to vector<8x32xf32>
    %18 = vector.shape_cast %17 : vector<8x32xf32> to vector<1x8x32xf32>
    %19 = arith.truncf %18 : vector<1x8x32xf32> to vector<1x8x32xbf16>
    %20 = vector.extract_strided_slice %11 {offsets = [0, 32], sizes = [8, 32], strides = [1, 1]} : vector<8x64xf32> to vector<8x32xf32>
    %21 = vector.shape_cast %20 : vector<8x32xf32> to vector<1x8x32xf32>
    %22 = arith.truncf %21 : vector<1x8x32xf32> to vector<1x8x32xbf16>
    %23 = vector.shape_cast %16 : vector<8x32xf32> to vector<1x8x32xf32>
    %24 = arith.truncf %23 : vector<1x8x32xf32> to vector<1x8x32xbf16>
    %25 = vector.extract_strided_slice %19 {offsets = [0, 0, 0], sizes = [1, 8, 8], strides = [1, 1, 1]} : vector<1x8x32xbf16> to vector<1x8x8xbf16>
    %26 = vector.extract_strided_slice %19 {offsets = [0, 0, 8], sizes = [1, 8, 8], strides = [1, 1, 1]} : vector<1x8x32xbf16> to vector<1x8x8xbf16>
    %27 = vector.extract_strided_slice %19 {offsets = [0, 0, 16], sizes = [1, 8, 8], strides = [1, 1, 1]} : vector<1x8x32xbf16> to vector<1x8x8xbf16>
    %28 = vector.extract_strided_slice %19 {offsets = [0, 0, 24], sizes = [1, 8, 8], strides = [1, 1, 1]} : vector<1x8x32xbf16> to vector<1x8x8xbf16>
    %29 = tpu.concatenate %25, %26, %27, %28 in 0 : vector<1x8x8xbf16>, vector<1x8x8xbf16>, vector<1x8x8xbf16>, vector<1x8x8xbf16> -> vector<4x8x8xbf16>
    %30 = vector.extract_strided_slice %22 {offsets = [0, 0, 0], sizes = [1, 8, 8], strides = [1, 1, 1]} : vector<1x8x32xbf16> to vector<1x8x8xbf16>
    %31 = vector.extract_strided_slice %22 {offsets = [0, 0, 8], sizes = [1, 8, 8], strides = [1, 1, 1]} : vector<1x8x32xbf16> to vector<1x8x8xbf16>
    %32 = vector.extract_strided_slice %22 {offsets = [0, 0, 16], sizes = [1, 8, 8], strides = [1, 1, 1]} : vector<1x8x32xbf16> to vector<1x8x8xbf16>
    %33 = vector.extract_strided_slice %22 {offsets = [0, 0, 24], sizes = [1, 8, 8], strides = [1, 1, 1]} : vector<1x8x32xbf16> to vector<1x8x8xbf16>
    %34 = tpu.concatenate %30, %31, %32, %33 in 0 : vector<1x8x8xbf16>, vector<1x8x8xbf16>, vector<1x8x8xbf16>, vector<1x8x8xbf16> -> vector<4x8x8xbf16>
    %35 = vector.extract_strided_slice %24 {offsets = [0, 0, 0], sizes = [1, 8, 8], strides = [1, 1, 1]} : vector<1x8x32xbf16> to vector<1x8x8xbf16>
    %36 = vector.extract_strided_slice %24 {offsets = [0, 0, 8], sizes = [1, 8, 8], strides = [1, 1, 1]} : vector<1x8x32xbf16> to vector<1x8x8xbf16>
    %37 = vector.extract_strided_slice %24 {offsets = [0, 0, 16], sizes = [1, 8, 8], strides = [1, 1, 1]} : vector<1x8x32xbf16> to vector<1x8x8xbf16>
    %38 = vector.extract_strided_slice %24 {offsets = [0, 0, 24], sizes = [1, 8, 8], strides = [1, 1, 1]} : vector<1x8x32xbf16> to vector<1x8x8xbf16>
    %39 = tpu.concatenate %35, %36, %37, %38 in 0 : vector<1x8x8xbf16>, vector<1x8x8xbf16>, vector<1x8x8xbf16>, vector<1x8x8xbf16> -> vector<4x8x8xbf16>
    "tpu.trace_start"() <{level = 10 : i32, message = "bqd,bkd->bqk"}> : () -> ()
    %cst_14 = arith.constant dense<0.000000e+00> : vector<4x8x8xf32>
    %40 = tpu.matmul %29, %34, %cst_14 {dimension_numbers = #tpu.dot_dimension_numbers<[2], [2], [1], [1], [0, 0, 0, 1, 1, 1], [0], [0]>} : vector<4x8x8xbf16>, vector<4x8x8xbf16>, vector<4x8x8xf32> -> vector<4x8x8xf32>
    "tpu.trace_stop"() : () -> ()
    %cst_15 = arith.constant dense<0xFF800000> : vector<4x8xf32>
    %41 = vector.multi_reduction <maximumf>, %40, %cst_15 [2] : vector<4x8x8xf32> to vector<4x8xf32>
    %42 = vector.shape_cast %41 : vector<4x8xf32> to vector<4x8x1xf32>
    %43 = vector.broadcast %42 : vector<4x8x1xf32> to vector<4x8x8xf32>
    %44 = arith.subf %40, %43 : vector<4x8x8xf32>
    %45 = math.exp %44 : vector<4x8x8xf32>
    %cst_16 = arith.constant dense<0.000000e+00> : vector<4x8xf32>
    %46 = vector.multi_reduction <add>, %45, %cst_16 [2] : vector<4x8x8xf32> to vector<4x8xf32>
    %47 = vector.shape_cast %46 : vector<4x8xf32> to vector<4x8x1xf32>
    %48 = arith.truncf %45 : vector<4x8x8xf32> to vector<4x8x8xbf16>
    "tpu.trace_start"() <{level = 10 : i32, message = "bqk,bkd->bqd"}> : () -> ()
    %cst_17 = arith.constant dense<0.000000e+00> : vector<4x8x8xf32>
    %49 = tpu.matmul %48, %39, %cst_17 {dimension_numbers = #tpu.dot_dimension_numbers<[2], [1], [1], [2], [0, 0, 0, 1, 1, 2], [0], [0]>} : vector<4x8x8xbf16>, vector<4x8x8xbf16>, vector<4x8x8xf32> -> vector<4x8x8xf32>
    "tpu.trace_stop"() : () -> ()
    %50 = tpu.reciprocal %47 {approx = true} : vector<4x8x1xf32> -> vector<4x8x1xf32>
    %51 = vector.broadcast %50 : vector<4x8x1xf32> to vector<4x8x8xf32>
    %52 = arith.mulf %49, %51 : vector<4x8x8xf32>
    %53 = vector.extract_strided_slice %52 {offsets = [0, 0, 0], sizes = [1, 8, 8], strides = [1, 1, 1]} : vector<4x8x8xf32> to vector<1x8x8xf32>
    %54 = vector.extract_strided_slice %52 {offsets = [1, 0, 0], sizes = [1, 8, 8], strides = [1, 1, 1]} : vector<4x8x8xf32> to vector<1x8x8xf32>
    %55 = vector.extract_strided_slice %52 {offsets = [2, 0, 0], sizes = [1, 8, 8], strides = [1, 1, 1]} : vector<4x8x8xf32> to vector<1x8x8xf32>
    %56 = vector.extract_strided_slice %52 {offsets = [3, 0, 0], sizes = [1, 8, 8], strides = [1, 1, 1]} : vector<4x8x8xf32> to vector<1x8x8xf32>
    %57 = tpu.concatenate %53, %54, %55, %56 in 2 : vector<1x8x8xf32>, vector<1x8x8xf32>, vector<1x8x8xf32>, vector<1x8x8xf32> -> vector<1x8x32xf32>
    %58 = vector.shape_cast %57 : vector<1x8x32xf32> to vector<8x32xf32>
    %59 = arith.truncf %58 : vector<8x32xf32> to vector<8x32xbf16>
    %c0_18 = arith.constant 0 : index
    %c0_19 = arith.constant 0 : index
    %60 = vector.load %arg7[%c0_18, %c0_19] : memref<32x32xbf16, #tpu.memory_space<vmem>>, vector<32x32xbf16>
    %cst_20 = arith.constant dense<0.000000e+00> : vector<8x32xf32>
    %61 = tpu.matmul %59, %60, %cst_20 {dimension_numbers = #tpu.dot_dimension_numbers<[1], [0], [0], [1], [0, 0, 1, 1], [], []>} : vector<8x32xbf16>, vector<32x32xbf16>, vector<8x32xf32> -> vector<8x32xf32>
    %c0_21 = arith.constant 0 : index
    %c0_22 = arith.constant 0 : index
    %62 = vector.load %arg8[%c0_21, %c0_22] : memref<1x32xf32, #tpu.memory_space<vmem>>, vector<1x32xf32>
    %63 = vector.broadcast %62 : vector<1x32xf32> to vector<8x32xf32>
    %64 = arith.addf %61, %63 : vector<8x32xf32>
    %65 = arith.addf %2, %64 : vector<8x32xf32>
    %c0_23 = arith.constant 0 : index
    %c0_24 = arith.constant 0 : index
    %66 = vector.load %arg9[%c0_23, %c0_24] : memref<1x32xf32, #tpu.memory_space<vmem>>, vector<1x32xf32>
    %c0_25 = arith.constant 0 : index
    %c0_26 = arith.constant 0 : index
    %67 = vector.load %arg10[%c0_25, %c0_26] : memref<1x32xf32, #tpu.memory_space<vmem>>, vector<1x32xf32>
    %cst_27 = arith.constant dense<0.000000e+00> : vector<8xf32>
    %68 = vector.multi_reduction <add>, %65, %cst_27 [1] : vector<8x32xf32> to vector<8xf32>
    %69 = vector.shape_cast %68 : vector<8xf32> to vector<8x1xf32>
    %cst_28 = arith.constant 3.200000e+01 : f32
    %70 = vector.broadcast %cst_28 : f32 to vector<8x1xf32>
    %71 = arith.divf %69, %70 : vector<8x1xf32>
    %72 = arith.mulf %65, %65 : vector<8x32xf32>
    %cst_29 = arith.constant dense<0.000000e+00> : vector<8xf32>
    %73 = vector.multi_reduction <add>, %72, %cst_29 [1] : vector<8x32xf32> to vector<8xf32>
    %74 = vector.shape_cast %73 : vector<8xf32> to vector<8x1xf32>
    %cst_30 = arith.constant 3.200000e+01 : f32
    %75 = vector.broadcast %cst_30 : f32 to vector<8x1xf32>
    %76 = arith.divf %74, %75 : vector<8x1xf32>
    %77 = arith.mulf %71, %71 : vector<8x1xf32>
    %78 = arith.subf %76, %77 : vector<8x1xf32>
    %cst_31 = arith.constant 0.000000e+00 : f32
    %79 = vector.broadcast %cst_31 : f32 to vector<8x1xf32>
    %80 = arith.maximumf %78, %79 : vector<8x1xf32>
    %81 = vector.broadcast %71 : vector<8x1xf32> to vector<8x32xf32>
    %82 = arith.subf %65, %81 : vector<8x32xf32>
    %cst_32 = arith.constant 9.99999974E-6 : f32
    %83 = vector.broadcast %cst_32 : f32 to vector<8x1xf32>
    %84 = arith.addf %80, %83 : vector<8x1xf32>
    %85 = math.rsqrt %84 : vector<8x1xf32>
    %86 = vector.broadcast %85 : vector<8x1xf32> to vector<8x32xf32>
    %87 = arith.mulf %82, %86 : vector<8x32xf32>
    %88 = vector.broadcast %66 : vector<1x32xf32> to vector<8x32xf32>
    %89 = arith.mulf %87, %88 : vector<8x32xf32>
    %90 = vector.broadcast %67 : vector<1x32xf32> to vector<8x32xf32>
    %91 = arith.addf %89, %90 : vector<8x32xf32>
    %92 = arith.truncf %91 : vector<8x32xf32> to vector<8x32xbf16>
    %c0_33 = arith.constant 0 : index
    %c0_34 = arith.constant 0 : index
    %93 = vector.load %arg11[%c0_33, %c0_34] : memref<32x64xbf16, #tpu.memory_space<vmem>>, vector<32x64xbf16>
    %cst_35 = arith.constant dense<0.000000e+00> : vector<8x64xf32>
    %94 = tpu.matmul %92, %93, %cst_35 {dimension_numbers = #tpu.dot_dimension_numbers<[1], [0], [0], [1], [0, 0, 1, 1], [], []>} : vector<8x32xbf16>, vector<32x64xbf16>, vector<8x64xf32> -> vector<8x64xf32>
    %c0_36 = arith.constant 0 : index
    %c0_37 = arith.constant 0 : index
    %95 = vector.load %arg12[%c0_36, %c0_37] : memref<1x64xf32, #tpu.memory_space<vmem>>, vector<1x64xf32>
    %96 = vector.broadcast %95 : vector<1x64xf32> to vector<8x64xf32>
    %97 = arith.addf %94, %96 : vector<8x64xf32>
    %cst_38 = arith.constant 0.000000e+00 : f32
    %98 = vector.broadcast %cst_38 : f32 to vector<8x64xf32>
    %99 = arith.maximumf %97, %98 : vector<8x64xf32>
    %100 = arith.truncf %99 : vector<8x64xf32> to vector<8x64xbf16>
    %c0_39 = arith.constant 0 : index
    %c0_40 = arith.constant 0 : index
    %101 = vector.load %arg13[%c0_39, %c0_40] : memref<64x32xbf16, #tpu.memory_space<vmem>>, vector<64x32xbf16>
    %cst_41 = arith.constant dense<0.000000e+00> : vector<8x32xf32>
    %102 = tpu.matmul %100, %101, %cst_41 {dimension_numbers = #tpu.dot_dimension_numbers<[1], [0], [0], [1], [0, 0, 1, 1], [], []>} : vector<8x64xbf16>, vector<64x32xbf16>, vector<8x32xf32> -> vector<8x32xf32>
    %c0_42 = arith.constant 0 : index
    %c0_43 = arith.constant 0 : index
    %103 = vector.load %arg14[%c0_42, %c0_43] : memref<1x32xf32, #tpu.memory_space<vmem>>, vector<1x32xf32>
    %104 = vector.broadcast %103 : vector<1x32xf32> to vector<8x32xf32>
    %105 = arith.addf %102, %104 : vector<8x32xf32>
    %106 = arith.addf %91, %105 : vector<8x32xf32>
    %c0_44 = arith.constant 0 : index
    %c0_45 = arith.constant 0 : index
    %107 = vector.load %arg15[%c0_44, %c0_45] : memref<1x32xf32, #tpu.memory_space<vmem>>, vector<1x32xf32>
    %c0_46 = arith.constant 0 : index
    %c0_47 = arith.constant 0 : index
    %108 = vector.load %arg16[%c0_46, %c0_47] : memref<1x32xf32, #tpu.memory_space<vmem>>, vector<1x32xf32>
    %cst_48 = arith.constant dense<0.000000e+00> : vector<8xf32>
    %109 = vector.multi_reduction <add>, %106, %cst_48 [1] : vector<8x32xf32> to vector<8xf32>
    %110 = vector.shape_cast %109 : vector<8xf32> to vector<8x1xf32>
    %cst_49 = arith.constant 3.200000e+01 : f32
    %111 = vector.broadcast %cst_49 : f32 to vector<8x1xf32>
    %112 = arith.divf %110, %111 : vector<8x1xf32>
    %113 = arith.mulf %106, %106 : vector<8x32xf32>
    %cst_50 = arith.constant dense<0.000000e+00> : vector<8xf32>
    %114 = vector.multi_reduction <add>, %113, %cst_50 [1] : vector<8x32xf32> to vector<8xf32>
    %115 = vector.shape_cast %114 : vector<8xf32> to vector<8x1xf32>
    %cst_51 = arith.constant 3.200000e+01 : f32
    %116 = vector.broadcast %cst_51 : f32 to vector<8x1xf32>
    %117 = arith.divf %115, %116 : vector<8x1xf32>
    %118 = arith.mulf %112, %112 : vector<8x1xf32>
    %119 = arith.subf %117, %118 : vector<8x1xf32>
    %cst_52 = arith.constant 0.000000e+00 : f32
    %120 = vector.broadcast %cst_52 : f32 to vector<8x1xf32>
    %121 = arith.maximumf %119, %120 : vector<8x1xf32>
    %122 = vector.broadcast %112 : vector<8x1xf32> to vector<8x32xf32>
    %123 = arith.subf %106, %122 : vector<8x32xf32>
    %cst_53 = arith.constant 9.99999974E-6 : f32
    %124 = vector.broadcast %cst_53 : f32 to vector<8x1xf32>
    %125 = arith.addf %121, %124 : vector<8x1xf32>
    %126 = math.rsqrt %125 : vector<8x1xf32>
    %127 = vector.broadcast %126 : vector<8x1xf32> to vector<8x32xf32>
    %128 = arith.mulf %123, %127 : vector<8x32xf32>
    %129 = vector.broadcast %107 : vector<1x32xf32> to vector<8x32xf32>
    %130 = arith.mulf %128, %129 : vector<8x32xf32>
    %131 = vector.broadcast %108 : vector<1x32xf32> to vector<8x32xf32>
    %132 = arith.addf %130, %131 : vector<8x32xf32>
    %133 = vector.shape_cast %132 : vector<8x32xf32> to vector<1x8x32xf32>
    %c0_54 = arith.constant 0 : index
    %c0_55 = arith.constant 0 : index
    %c0_56 = arith.constant 0 : index
    %134 = vector.load %arg17[%c0_54, %c0_55, %c0_56] : memref<1x8x32xf32, #tpu.memory_space<vmem>>, vector<1x8x32xf32>
    tpu.vector_store %arg17[%c0_54, %c0_55, %c0_56], %133 {strides = array<i32>} : memref<1x8x32xf32, #tpu.memory_space<vmem>>, vector<1x8x32xf32>,
    return
  }
  func.func @transform_0(%arg0: i32) -> (i32, i32, i32) {
    %c0_i32 = arith.constant 0 : i32
    %c0_i32_0 = arith.constant 0 : i32
    %c0_i32_1 = arith.constant 0 : i32
    return %arg0, %c0_i32, %c0_i32_0 : i32, i32, i32
  }
  func.func @transform_1(%arg0: i32) -> (i32, i32, i32) {
    %c0_i32 = arith.constant 0 : i32
    %c0_i32_0 = arith.constant 0 : i32
    %c0_i32_1 = arith.constant 0 : i32
    return %arg0, %c0_i32, %c0_i32_0 : i32, i32, i32
  }
  func.func @transform_2(%arg0: i32) -> (i32, i32) {
    %c0_i32 = arith.constant 0 : i32
    %c0_i32_0 = arith.constant 0 : i32
    %c0_i32_1 = arith.constant 0 : i32
    return %c0_i32, %c0_i32_0 : i32, i32
  }
  func.func @transform_3(%arg0: i32) -> (i32, i32) {
    %c0_i32 = arith.constant 0 : i32
    %c0_i32_0 = arith.constant 0 : i32
    %c0_i32_1 = arith.constant 0 : i32
    return %c0_i32, %c0_i32_0 : i32, i32
  }
  func.func @transform_4(%arg0: i32) -> (i32, i32) {
    %c0_i32 = arith.constant 0 : i32
    %c0_i32_0 = arith.constant 0 : i32
    %c0_i32_1 = arith.constant 0 : i32
    return %c0_i32, %c0_i32_0 : i32, i32
  }
  func.func @transform_5(%arg0: i32) -> (i32, i32) {
    %c0_i32 = arith.constant 0 : i32
    %c0_i32_0 = arith.constant 0 : i32
    %c0_i32_1 = arith.constant 0 : i32
    return %c0_i32, %c0_i32_0 : i32, i32
  }
  func.func @transform_6(%arg0: i32) -> (i32, i32) {
    %c0_i32 = arith.constant 0 : i32
    %c0_i32_0 = arith.constant 0 : i32
    %c0_i32_1 = arith.constant 0 : i32
    return %c0_i32, %c0_i32_0 : i32, i32
  }
  func.func @transform_7(%arg0: i32) -> (i32, i32) {
    %c0_i32 = arith.constant 0 : i32
    %c0_i32_0 = arith.constant 0 : i32
    %c0_i32_1 = arith.constant 0 : i32
    return %c0_i32, %c0_i32_0 : i32, i32
  }
  func.func @transform_8(%arg0: i32) -> (i32, i32) {
    %c0_i32 = arith.constant 0 : i32
    %c0_i32_0 = arith.constant 0 : i32
    %c0_i32_1 = arith.constant 0 : i32
    return %c0_i32, %c0_i32_0 : i32, i32
  }
  func.func @transform_9(%arg0: i32) -> (i32, i32) {
    %c0_i32 = arith.constant 0 : i32
    %c0_i32_0 = arith.constant 0 : i32
    %c0_i32_1 = arith.constant 0 : i32
    return %c0_i32, %c0_i32_0 : i32, i32
  }
  func.func @transform_10(%arg0: i32) -> (i32, i32) {
    %c0_i32 = arith.constant 0 : i32
    %c0_i32_0 = arith.constant 0 : i32
    %c0_i32_1 = arith.constant 0 : i32
    return %c0_i32, %c0_i32_0 : i32, i32
  }
  func.func @transform_11(%arg0: i32) -> (i32, i32) {
    %c0_i32 = arith.constant 0 : i32
    %c0_i32_0 = arith.constant 0 : i32
    %c0_i32_1 = arith.constant 0 : i32
    return %c0_i32, %c0_i32_0 : i32, i32
  }
  func.func @transform_12(%arg0: i32) -> (i32, i32) {
    %c0_i32 = arith.constant 0 : i32
    %c0_i32_0 = arith.constant 0 : i32
    %c0_i32_1 = arith.constant 0 : i32
    return %c0_i32, %c0_i32_0 : i32, i32
  }
  func.func @transform_13(%arg0: i32) -> (i32, i32) {
    %c0_i32 = arith.constant 0 : i32
    %c0_i32_0 = arith.constant 0 : i32
    %c0_i32_1 = arith.constant 0 : i32
    return %c0_i32, %c0_i32_0 : i32, i32
  }
  func.func @transform_14(%arg0: i32) -> (i32, i32) {
    %c0_i32 = arith.constant 0 : i32
    %c0_i32_0 = arith.constant 0 : i32
    %c0_i32_1 = arith.constant 0 : i32
    return %c0_i32, %c0_i32_0 : i32, i32
  }
  func.func @transform_15(%arg0: i32) -> (i32, i32) {
    %c0_i32 = arith.constant 0 : i32
    %c0_i32_0 = arith.constant 0 : i32
    %c0_i32_1 = arith.constant 0 : i32
    return %c0_i32, %c0_i32_0 : i32, i32
  }
  func.func @transform_16(%arg0: i32) -> (i32, i32, i32) {
    %c0_i32 = arith.constant 0 : i32
    %c0_i32_0 = arith.constant 0 : i32
    %c0_i32_1 = arith.constant 0 : i32
    return %arg0, %c0_i32, %c0_i32_0 : i32, i32, i32
  }
}

</mosaic_0001>

<bundles_post_ra>
// kernel: fwd.2
= control target key start
LH: loop header
LB: loop body
LE: loop exit
PB: predicated region body
PF: predicated region fallthrough
CT: control target
= control target key end

     0   :  { %s3626_s0 = inlined_call_operand.hbm [shape: f32[2,8,32], index: 0, kind: input, shape index: {}]   ;;  %s3627_s1 = inlined_call_operand.hbm [shape: f32[2,8,32], index: 1, kind: input, shape index: {}]   ;;  %s3628_s2 = inlined_call_operand.hbm [shape: bf16[32,64], index: 2, kind: input, shape index: {}]   ;;  %s3629_s3 = inlined_call_operand.hbm [shape: f32[1,64], index: 3, kind: input, shape index: {}]   ;;  %s3630_s4 = inlined_call_operand.hbm [shape: bf16[32,32], index: 4, kind: input, shape index: {}]   ;;  %s3631_s5 = inlined_call_operand.hbm [shape: f32[1,32], index: 5, kind: input, shape index: {}]   ;;  %s3632_s6 = inlined_call_operand.hbm [shape: bf16[32,32], index: 6, kind: input, shape index: {}]   ;;  %s3633_s7 = inlined_call_operand.hbm [shape: f32[1,32], index: 7, kind: input, shape index: {}]   ;;  %s3634_s8 = inlined_call_operand.hbm [shape: f32[1,32], index: 8, kind: input, shape index: {}]   ;;  %s3635_s9 = inlined_call_operand.hbm [shape: f32[1,32], index: 9, kind: input, shape index: {}]   ;;  %s3636_s10 = inlined_call_operand.hbm [shape: bf16[32,64], index: 10, kind: input, shape index: {}]   ;;  %s3637_s11 = inlined_call_operand.hbm [shape: f32[1,64], index: 11, kind: input, shape index: {}]   ;;  %s3638_s12 = inlined_call_operand.hbm [shape: bf16[64,32], index: 12, kind: input, shape index: {}]   ;;  %s3639_s13 = inlined_call_operand.hbm [shape: f32[1,32], index: 13, kind: input, shape index: {}]   ;;  %s3640_s14 = inlined_call_operand.hbm [shape: f32[1,32], index: 14, kind: input, shape index: {}]   ;;  %s3641_s15 = inlined_call_operand.hbm [shape: f32[1,32], index: 15, kind: input, shape index: {}]   ;;  %s3642_s16 = inlined_call_operand.hbm [shape: f32[2,8,32], index: 16, kind: output, shape index: {}]  }
   0x1   :  { %3658 = sst [smem:[#allocation45_spill]] %s3626_s0 }
   0x2   :  { %3659 = sst [smem:[#allocation46_spill]] %s3627_s1 }
   0x3   :  { %3660 = sst [smem:[#allocation47_spill]] %s3628_s2 }
   0x4   :  { %3661 = sst [smem:[#allocation48_spill]] %s3629_s3 }
   0x5   :  { %3662 = sst [smem:[#allocation49_spill]] %s3630_s4 }
   0x6   :  { %3663 = sst [smem:[#allocation50_spill]] %s3631_s5 }
   0x7   :  { %3664 = sst [smem:[#allocation51_spill]] %s3632_s6 }
   0x8   :  { %3665 = sst [smem:[#allocation52_spill]] %s3633_s7 }
   0x9   :  { %3666 = sst [smem:[#allocation53_spill]] %s3634_s8 }
   0xa   :  { %3667 = sst [smem:[#allocation54_spill]] %s3642_s16 }
   0xb   :  { %21 = vsyncpa [#allocation3], 0 }
   0xc   :  { %23 = vsyncpa [#allocation3 + $0x1], 0 }
   0xd   :  { %24 = vsyncpa [#allocation6], 0 }
   0xe   :  { %26 = vsyncpa [#allocation6 + $0x1], 0 }
   0xf   :  { %27 = vsyncpa [#allocation9], 0 }
  0x10   :  { %28 = vsyncpa [#allocation12], 0 }
  0x11   :  { %29 = vsyncpa [#allocation15], 0 }
  0x12   :  { %30 = vsyncpa [#allocation18], 0 }
  0x13   :  { %31 = vsyncpa [#allocation21], 0 }
  0x14   :  { %32 = vsyncpa [#allocation24], 0 }
  0x15   :  { %33 = vsyncpa [#allocation27], 0 }
  0x16   :  { %34 = vsyncpa [#allocation4], 0 }
  0x17   :  { %36 = vsyncpa [#allocation4 + $0x1], 0  ;;  %s2990_s21 = smov 0   ;;  %s2992_s22 = smov 0  }
  0x18   :  { %s2994_s23 = smov 0   ;;  %s2996_s24 = smov 0  }
  0x19 LB: > { %3668 = sst [smem:[#allocation40_spill]] %s2863_s21  ;;  %s2877_s25 = smov [#allocation7]   ;;  %s2875_s24 = sphi %s2996_s24, %s3725_s24   ;;  %s2871_s23 = sphi %s2994_s23, %s3724_s23   ;;  %s2867_s22 = sphi %s2992_s22, %s3723_s22   ;;  %s2863_s21 = sphi %s2990_s21, %s3722_s21  }
  0x1a   : > { %3669 = sst [smem:[#allocation41_spill]] %s2867_s22  ;;  %s431_s26 = sshll.u32 %s2877_s25, 4  ;;  %s3016_s26 = int_to_ptr.vmem [resolvable:$true] %s431_s26 }
  0x1b   : > { %3670 = sst [smem:[#allocation42_spill]] %s2871_s23  ;;  %s3011_s27 = sadd.s32 4294967295, %s2875_s24  }
  0x1c   : > { %3671 = sst [smem:[#allocation43_spill]] %s3011_s27  ;;  %p1885_p0 = scmp.ge.s32.totalorder %s2875_s24, 1 }
  0x1d   : > { %p3654_p1 = scmp.eq.s32.totalorder %s3011_s27, 0  ;;  %p419_p2 = scmp.lt.s32.totalorder %s2875_s24, 3 }
  0x1e   : > { %s2878_s29 = smov [#allocation8]   ;;  %s2879_s17 = smov [#allocation11]  }
  0x1f   : > { %p3018_p3 = pnand %p1885_p0, %p419_p2  ;;  %s445_s30 = sshll.u32 %s2878_s29, 4  ;;  %s3031_s30 = int_to_ptr.vmem [resolvable:$true] %s445_s30 }
  0x20   : > { %s469_s18 = sshll.u32 %s2879_s17, 4  ;;  %s3675_s2 = sld [smem:[#allocation47_spill]]  ;;  %s3033_s18 = int_to_ptr.vmem [resolvable:$true] %s469_s18 }
  0x21   : > { %s3672_s28 = scalar_select %p3018_p3, 1, 0 }
  0x22   : > { %p2148_p5 = pneg %p3018_p3 }
  0x23   : > { %3673 = sst [smem:[#allocation44_spill]] %s3672_s28 }
  0x24   : > { %p3027_p6 = pnand %p2148_p5, %p3654_p1 }
  0x26   : > { %s2321_s25 = scalar_lea.hbm %s3675_s2, 256  ;;  %p3043_p8 = pneg %p3027_p6 }
  0x27   : > { %p2322_p7 = scmp.ne.s32.totalorder %s3675_s2, %s2321_s25  ;;  %p2328_p11 = scmp.lt.u32.totalorder %s2321_s25, %s3675_s2 }
  0x29   : > { %p2324_p9 = pnand %p3043_p8, %p2322_p7 }
  0x2b   : > { %p2325_p10 = pneg %p2324_p9 }
  0x2d   : > { %p2330_p12 = pnand %p2328_p11, %p2325_p10 }
  0x2f   : > { %2333 = shalt.err (!%p2330_p12)
}
  0x30   : > { %s2334_s16 = scalar_lea.vmem %s3016_s26, 256  ;;  %p2342_p5 = scmp.lt.s32.totalorder %s3016_s26, %s3016_s26 }
  0x31   : > { %p2335_p13 = scmp.ne.s32.totalorder %s3016_s26, %s2334_s16  ;;  %p2343_p4 = scmp.lt.s32.totalorder %s2334_s16, %s2334_s16 }
  0x33   : > { %p2337_p0 = pnand %p2335_p13, %p3043_p8  ;;  %p2344_p7 = por %p2343_p4, %p2342_p5 }
  0x35   : > { %p2338_p2 = pneg %p2337_p0 }
  0x37   : > { %p2345_p9 = pnand %p2344_p7, %p2338_p2 }
  0x39   : > { %2348 = shalt.err (!%p2345_p9)
}
  0x3a   : > { %s3652_s28 = smov 64   ;;  %s2881_s1 = smov 4  }
  0x3b   : > { %2151 = dma.hbm_to_vmem [thread:$0]  (!%p3027_p6), %s3675_s2, 256, %s3016_s26, [#allocation6], %s3652_s28, %s3652_s28, %s2881_s1  }
  0x3c   : > { %s3677_s3 = sld [smem:[#allocation48_spill]] }
  0x42   : > { %s2349_s16 = scalar_lea.hbm %s3677_s3, 16 }
  0x43   : > { %p2350_p4 = scmp.ne.s32.totalorder %s3677_s3, %s2349_s16  ;;  %p2356_p12 = scmp.lt.u32.totalorder %s2349_s16, %s3677_s3 }
  0x45   : > { %p2352_p10 = pnand %p2350_p4, %p3043_p8 }
  0x47   : > { %p2353_p11 = pneg %p2352_p10 }
  0x49   : > { %p2358_p13 = pnand %p2356_p12, %p2353_p11 }
  0x4b   : > { %2361 = shalt.err (!%p2358_p13)
}
  0x4c   : > { %s2362_s26 = scalar_lea.vmem %s3031_s30, 16  ;;  %s2369_s21 = scalar_lea.vmem %s3031_s30, 32 }
  0x4d   : > { %p2363_p0 = scmp.ne.s32.totalorder %s3031_s30, %s2362_s26  ;;  %p2370_p7 = scmp.lt.s32.totalorder %s3031_s30, %s3031_s30 }
  0x4e   : > { %p2371_p9 = scmp.lt.s32.totalorder %s2369_s21, %s2362_s26 }
  0x4f   : > { %p2365_p2 = pnand %p2363_p0, %p3043_p8 }
  0x50   : > { %p2372_p4 = por %p2371_p9, %p2370_p7 }
  0x51   : > { %p2366_p5 = pneg %p2365_p2 }
  0x53   : > { %p2373_p10 = pnand %p2372_p4, %p2366_p5 }
  0x55   : > { %2376 = shalt.err (!%p2373_p10)
}
  0x56   : > { %2154 = dma.hbm_to_vmem [thread:$0]  (!%p3027_p6), %s3677_s3, 16, %s3031_s30, [#allocation9]  }
  0x57   : > { %s3678_s5 = sld [smem:[#allocation50_spill]] }
  0x5d   : > { %s2377_s20 = scalar_lea.hbm %s3678_s5, 16 }
  0x5e   : > { %p2378_p11 = scmp.ne.s32.totalorder %s3678_s5, %s2377_s20  ;;  %p2384_p0 = scmp.lt.u32.totalorder %s2377_s20, %s3678_s5 }
  0x60   : > { %p2380_p12 = pnand %p2378_p11, %p3043_p8 }
  0x62   : > { %p2381_p13 = pneg %p2380_p12 }
  0x64   : > { %p2386_p2 = pnand %p2384_p0, %p2381_p13 }
  0x66   : > { %2389 = shalt.err (!%p2386_p2)
}
  0x67   : > { %s2390_s30 = scalar_lea.vmem %s3033_s18, 16  ;;  %s2397_s21 = scalar_lea.vmem %s3033_s18, 32 }
  0x68   : > { %p2391_p5 = scmp.ne.s32.totalorder %s3033_s18, %s2390_s30  ;;  %p2398_p4 = scmp.lt.s32.totalorder %s3033_s18, %s3033_s18 }
  0x69   : > { %p2399_p10 = scmp.lt.s32.totalorder %s2397_s21, %s2390_s30 }
  0x6a   : > { %p2393_p7 = pnand %p2391_p5, %p3043_p8 }
  0x6b   : > { %p2400_p11 = por %p2399_p10, %p2398_p4 }
  0x6c   : > { %p2394_p9 = pneg %p2393_p7 }
  0x6e   : > { %p2401_p12 = pnand %p2400_p11, %p2394_p9 }
  0x70   : > { %2404 = shalt.err (!%p2401_p12)
}
  0x71   : > { %2160 = dma.hbm_to_vmem [thread:$0]  (!%p3027_p6), %s3678_s5, 16, %s3033_s18, [#allocation12]  }
  0x72   : > { %s2882_s27 = smov [#allocation14]   ;;  %s2883_s20 = smov [#allocation17]  }
  0x73   : > { %s493_s19 = sshll.u32 %s2882_s27, 4  ;;  %s515_s25 = sshll.u32 %s2883_s20, 4  ;;  %s494_s19 = int_to_ptr.vmem [resolvable:$true] %s493_s19  ;;  %s516_s25 = int_to_ptr.vmem [resolvable:$true] %s515_s25 }
  0x74   : > { %s3679_s7 = sld [smem:[#allocation52_spill]] }
  0x7a   : > { %s2405_s26 = scalar_lea.hbm %s3679_s7, 16 }
  0x7b   : > { %p2406_p13 = scmp.ne.s32.totalorder %s3679_s7, %s2405_s26  ;;  %p2412_p5 = scmp.lt.u32.totalorder %s2405_s26, %s3679_s7 }
  0x7d   : > { %p2408_p0 = pnand %p2406_p13, %p3043_p8 }
  0x7f   : > { %p2409_p2 = pneg %p2408_p0 }
  0x81   : > { %p2414_p7 = pnand %p2412_p5, %p2409_p2 }
  0x83   : > { %2417 = shalt.err (!%p2414_p7)
}
  0x84   : > { %s2418_s18 = scalar_lea.vmem %s494_s19, 16  ;;  %s2425_s23 = scalar_lea.vmem %s494_s19, 32 }
  0x85   : > { %p2419_p9 = scmp.ne.s32.totalorder %s494_s19, %s2418_s18  ;;  %p2426_p11 = scmp.lt.s32.totalorder %s494_s19, %s494_s19 }
  0x86   : > { %p2427_p12 = scmp.lt.s32.totalorder %s2425_s23, %s2418_s18 }
  0x87   : > { %p2421_p4 = pnand %p2419_p9, %p3043_p8 }
  0x88   : > { %p2428_p1 = por %p2427_p12, %p2426_p11 }
  0x89   : > { %p2422_p10 = pneg %p2421_p4 }
  0x8b   : > { %p2429_p3 = pnand %p2428_p1, %p2422_p10 }
  0x8d   : > { %2432 = shalt.err (!%p2429_p3)
}
  0x8e   : > { %2166 = dma.hbm_to_vmem [thread:$0]  (!%p3027_p6), %s3679_s7, 16, %s494_s19, [#allocation15]  }
  0x8f   : > { %s2433_s16 = scalar_lea.hbm %s3635_s9, 16 }
  0x90   : > { %p2434_p13 = scmp.ne.s32.totalorder %s3635_s9, %s2433_s16  ;;  %p2440_p3 = scmp.lt.u32.totalorder %s2433_s16, %s3635_s9 }
  0x92   : > { %p2436_p0 = pnand %p2434_p13, %p3043_p8 }
  0x94   : > { %p2437_p1 = pneg %p2436_p0 }
  0x96   : > { %p2442_p2 = pnand %p2440_p3, %p2437_p1 }
  0x98   : > { %2445 = shalt.err (!%p2442_p2)
}
  0x99   : > { %s2446_s18 = scalar_lea.vmem %s516_s25, 16  ;;  %s2453_s19 = scalar_lea.vmem %s516_s25, 32 }
  0x9a   : > { %p2447_p5 = scmp.ne.s32.totalorder %s516_s25, %s2446_s18  ;;  %p2454_p4 = scmp.lt.s32.totalorder %s516_s25, %s516_s25 }
  0x9b   : > { %p2455_p10 = scmp.lt.s32.totalorder %s2453_s19, %s2446_s18 }
  0x9c   : > { %p2449_p7 = pnand %p2447_p5, %p3043_p8 }
  0x9d   : > { %p2456_p11 = por %p2455_p10, %p2454_p4 }
  0x9e   : > { %p2450_p9 = pneg %p2449_p7 }
  0xa0   : > { %p2457_p12 = pnand %p2456_p11, %p2450_p9 }
  0xa2   : > { %2460 = shalt.err (!%p2457_p12)
}
  0xa3   : > { %2172 = dma.hbm_to_vmem [thread:$0]  (!%p3027_p6), %s3635_s9, 16, %s516_s25, [#allocation18]  }
  0xa4   : > { %s2884_s20 = smov [#allocation20]   ;;  %s2885_s17 = smov [#allocation23]  }
  0xa5   : > { %s539_s28 = sshll.u32 %s2884_s20, 4  ;;  %s563_s16 = sshll.u32 %s2885_s17, 4  ;;  %s540_s28 = int_to_ptr.vmem [resolvable:$true] %s539_s28  ;;  %s564_s16 = int_to_ptr.vmem [resolvable:$true] %s563_s16 }
  0xa6   : > { %s2461_s21 = scalar_lea.hbm %s3637_s11, 16 }
  0xa7   : > { %p2462_p13 = scmp.ne.s32.totalorder %s3637_s11, %s2461_s21  ;;  %p2468_p3 = scmp.lt.u32.totalorder %s2461_s21, %s3637_s11 }
  0xa9   : > { %p2464_p0 = pnand %p2462_p13, %p3043_p8 }
  0xab   : > { %p2465_p1 = pneg %p2464_p0 }
  0xad   : > { %p2470_p2 = pnand %p2468_p3, %p2465_p1 }
  0xaf   : > { %2473 = shalt.err (!%p2470_p2)
}
  0xb0   : > { %s2474_s25 = scalar_lea.vmem %s540_s28, 16  ;;  %s2481_s27 = scalar_lea.vmem %s540_s28, 32 }
  0xb1   : > { %p2475_p5 = scmp.ne.s32.totalorder %s540_s28, %s2474_s25  ;;  %p2482_p4 = scmp.lt.s32.totalorder %s540_s28, %s540_s28 }
  0xb2   : > { %p2483_p10 = scmp.lt.s32.totalorder %s2481_s27, %s2474_s25 }
  0xb3   : > { %p2477_p7 = pnand %p2475_p5, %p3043_p8 }
  0xb4   : > { %p2484_p11 = por %p2483_p10, %p2482_p4 }
  0xb5   : > { %p2478_p9 = pneg %p2477_p7 }
  0xb7   : > { %p2485_p12 = pnand %p2484_p11, %p2478_p9 }
  0xb9   : > { %2488 = shalt.err (!%p2485_p12)
}
  0xba   : > { %2178 = dma.hbm_to_vmem [thread:$0]  (!%p3027_p6), %s3637_s11, 16, %s540_s28, [#allocation21]  }
  0xbb   : > { %s2489_s21 = scalar_lea.hbm %s3639_s13, 16 }
  0xbc   : > { %p2490_p13 = scmp.ne.s32.totalorder %s3639_s13, %s2489_s21  ;;  %p2496_p3 = scmp.lt.u32.totalorder %s2489_s21, %s3639_s13 }
  0xbe   : > { %p2492_p0 = pnand %p2490_p13, %p3043_p8 }
  0xc0   : > { %p2493_p1 = pneg %p2492_p0 }
  0xc2   : > { %p2498_p2 = pnand %p2496_p3, %p2493_p1 }
  0xc4   : > { %2501 = shalt.err (!%p2498_p2)
}
  0xc5   : > { %s2502_s25 = scalar_lea.vmem %s564_s16, 16  ;;  %s2509_s28 = scalar_lea.vmem %s564_s16, 32 }
  0xc6   : > { %p2503_p5 = scmp.ne.s32.totalorder %s564_s16, %s2502_s25  ;;  %p2510_p4 = scmp.lt.s32.totalorder %s564_s16, %s564_s16 }
  0xc7   : > { %p2511_p10 = scmp.lt.s32.totalorder %s2509_s28, %s2502_s25 }
  0xc8   : > { %p2505_p7 = pnand %p2503_p5, %p3043_p8 }
  0xc9   : > { %p2512_p11 = por %p2511_p10, %p2510_p4 }
  0xca   : > { %p2506_p9 = pneg %p2505_p7 }
  0xcc   : > { %p2513_p12 = pnand %p2512_p11, %p2506_p9 }
  0xce   : > { %2516 = shalt.err (!%p2513_p12)
}
  0xcf   : > { %2184 = dma.hbm_to_vmem [thread:$0]  (!%p3027_p6), %s3639_s13, 16, %s564_s16, [#allocation24]  }
  0xd0   : > { %s2886_s17 = smov [#allocation10]   ;;  %s2887_s30 = smov [#allocation13]  }
  0xd1   : > { %s455_s26 = sshll.u32 %s2886_s17, 4  ;;  %s479_s21 = sshll.u32 %s2887_s30, 4  ;;  %s456_s26 = int_to_ptr.vmem [resolvable:$true] %s455_s26  ;;  %s480_s21 = int_to_ptr.vmem [resolvable:$true] %s479_s21 }
  0xd2   : > { %s3680_s4 = sld [smem:[#allocation49_spill]] }
  0xd8   : > { %s2517_s19 = scalar_lea.hbm %s3680_s4, 256 }
  0xd9   : > { %p2518_p13 = scmp.ne.s32.totalorder %s3680_s4, %s2517_s19  ;;  %p2524_p3 = scmp.lt.u32.totalorder %s2517_s19, %s3680_s4 }
  0xdb   : > { %p2520_p0 = pnand %p2518_p13, %p3043_p8 }
  0xdd   : > { %p2521_p1 = pneg %p2520_p0 }
  0xdf   : > { %p2526_p2 = pnand %p2524_p3, %p2521_p1 }
  0xe1   : > { %2529 = shalt.err (!%p2526_p2)
}
  0xe2   : > { %s2530_s16 = scalar_lea.vmem %s456_s26, 256  ;;  %p2538_p4 = scmp.lt.s32.totalorder %s456_s26, %s456_s26 }
  0xe3   : > { %p2531_p5 = scmp.ne.s32.totalorder %s456_s26, %s2530_s16  ;;  %p2539_p10 = scmp.lt.s32.totalorder %s2530_s16, %s2530_s16 }
  0xe5   : > { %p2533_p7 = pnand %p2531_p5, %p3043_p8  ;;  %p2540_p11 = por %p2539_p10, %p2538_p4 }
  0xe7   : > { %p2534_p9 = pneg %p2533_p7 }
  0xe9   : > { %p2541_p12 = pnand %p2540_p11, %p2534_p9 }
  0xeb   : > { %2544 = shalt.err (!%p2541_p12)
}
  0xec   : > { %s3681_s20 = smov 64   ;;  %s3682_s6 = sld [smem:[#allocation51_spill]] }
  0xed   : > { %2157 = dma.hbm_to_vmem [thread:$0]  (!%p3027_p6), %s3680_s4, 256, %s456_s26, [#allocation9], %s3681_s20, %s3681_s20, %s2881_s1  }
  0xf2   : > { %s2545_s19 = scalar_lea.hbm %s3682_s6, 256 }
  0xf3   : > { %p2546_p13 = scmp.ne.s32.totalorder %s3682_s6, %s2545_s19  ;;  %p2552_p3 = scmp.lt.u32.totalorder %s2545_s19, %s3682_s6 }
  0xf5   : > { %p2548_p0 = pnand %p2546_p13, %p3043_p8 }
  0xf7   : > { %p2549_p1 = pneg %p2548_p0 }
  0xf9   : > { %p2554_p2 = pnand %p2552_p3, %p2549_p1 }
  0xfb   : > { %2557 = shalt.err (!%p2554_p2)
}
  0xfc   : > { %s2558_s16 = scalar_lea.vmem %s480_s21, 256  ;;  %p2566_p4 = scmp.lt.s32.totalorder %s480_s21, %s480_s21 }
  0xfd   : > { %p2559_p5 = scmp.ne.s32.totalorder %s480_s21, %s2558_s16  ;;  %p2567_p10 = scmp.lt.s32.totalorder %s2558_s16, %s2558_s16 }
  0xff   : > { %p2561_p7 = pnand %p2559_p5, %p3043_p8  ;;  %p2568_p11 = por %p2567_p10, %p2566_p4 }
 0x101   : > { %p2562_p9 = pneg %p2561_p7 }
 0x103   : > { %p2569_p12 = pnand %p2568_p11, %p2562_p9 }
 0x105   : > { %2572 = shalt.err (!%p2569_p12)
}
 0x106   : > { %2163 = dma.hbm_to_vmem [thread:$0]  (!%p3027_p6), %s3682_s6, 256, %s480_s21, [#allocation12], %s3681_s20, %s3681_s20, %s2881_s1  }
 0x107   : > { %s2888_s30 = smov [#allocation16]   ;;  %s2889_s18 = smov [#allocation19]  }
 0x108   : > { %s504_s22 = sshll.u32 %s2888_s30, 4  ;;  %s525_s19 = sshll.u32 %s2889_s18, 4  ;;  %s505_s22 = int_to_ptr.vmem [resolvable:$true] %s504_s22  ;;  %s526_s19 = int_to_ptr.vmem [resolvable:$true] %s525_s19 }
 0x109   : > { %s3683_s8 = sld [smem:[#allocation53_spill]] }
 0x10f   : > { %s2573_s28 = scalar_lea.hbm %s3683_s8, 16 }
 0x110   : > { %p2574_p13 = scmp.ne.s32.totalorder %s3683_s8, %s2573_s28  ;;  %p2580_p3 = scmp.lt.u32.totalorder %s2573_s28, %s3683_s8 }
 0x112   : > { %p2576_p0 = pnand %p2574_p13, %p3043_p8 }
 0x114   : > { %p2577_p1 = pneg %p2576_p0 }
 0x116   : > { %p2582_p2 = pnand %p2580_p3, %p2577_p1 }
 0x118   : > { %2585 = shalt.err (!%p2582_p2)
}
 0x119   : > { %s2586_s21 = scalar_lea.vmem %s505_s22, 16  ;;  %s2593_s17 = scalar_lea.vmem %s505_s22, 32 }
 0x11a   : > { %p2587_p5 = scmp.ne.s32.totalorder %s505_s22, %s2586_s21  ;;  %p2594_p4 = scmp.lt.s32.totalorder %s505_s22, %s505_s22 }
 0x11b   : > { %p2595_p10 = scmp.lt.s32.totalorder %s2593_s17, %s2586_s21 }
 0x11c   : > { %p2589_p7 = pnand %p2587_p5, %p3043_p8 }
 0x11d   : > { %p2596_p11 = por %p2595_p10, %p2594_p4 }
 0x11e   : > { %p2590_p9 = pneg %p2589_p7 }
 0x120   : > { %p2597_p12 = pnand %p2596_p11, %p2590_p9 }
 0x122   : > { %2600 = shalt.err (!%p2597_p12)
}
 0x123   : > { %2169 = dma.hbm_to_vmem [thread:$0]  (!%p3027_p6), %s3683_s8, 16, %s505_s22, [#allocation15]  }
 0x124   : > { %s2601_s25 = scalar_lea.hbm %s3636_s10, 256 }
 0x125   : > { %p2602_p13 = scmp.ne.s32.totalorder %s3636_s10, %s2601_s25  ;;  %p2608_p3 = scmp.lt.u32.totalorder %s2601_s25, %s3636_s10 }
 0x127   : > { %p2604_p0 = pnand %p2602_p13, %p3043_p8 }
 0x129   : > { %p2605_p1 = pneg %p2604_p0 }
 0x12b   : > { %p2610_p2 = pnand %p2608_p3, %p2605_p1 }
 0x12d   : > { %2613 = shalt.err (!%p2610_p2)
}
 0x12e   : > { %s2614_s21 = scalar_lea.vmem %s526_s19, 256  ;;  %p2622_p4 = scmp.lt.s32.totalorder %s526_s19, %s526_s19 }
 0x12f   : > { %p2615_p5 = scmp.ne.s32.totalorder %s526_s19, %s2614_s21  ;;  %p2623_p10 = scmp.lt.s32.totalorder %s2614_s21, %s2614_s21 }
 0x131   : > { %p2617_p7 = pnand %p2615_p5, %p3043_p8  ;;  %p2624_p11 = por %p2623_p10, %p2622_p4 }
 0x133   : > { %p2618_p9 = pneg %p2617_p7 }
 0x135   : > { %p2625_p12 = pnand %p2624_p11, %p2618_p9 }
 0x137   : > { %2628 = shalt.err (!%p2625_p12)
}
 0x138   : > { %2175 = dma.hbm_to_vmem [thread:$0]  (!%p3027_p6), %s3636_s10, 256, %s526_s19, [#allocation18], %s3681_s20, %s3681_s20, %s2881_s1  }
 0x139   : > { %s2890_s30 = smov [#allocation22]   ;;  %s2891_s2 = smov [#allocation25]  }
 0x13a   : > { %s549_s18 = sshll.u32 %s2890_s30, 4  ;;  %s574_s23 = sshll.u32 %s2891_s2, 4  ;;  %s550_s18 = int_to_ptr.vmem [resolvable:$true] %s549_s18  ;;  %s575_s23 = int_to_ptr.vmem [resolvable:$true] %s574_s23 }
 0x13b   : > { %s2629_s27 = scalar_lea.hbm %s3638_s12, 512 }
 0x13c   : > { %p2630_p13 = scmp.ne.s32.totalorder %s3638_s12, %s2629_s27  ;;  %p2636_p3 = scmp.lt.u32.totalorder %s2629_s27, %s3638_s12 }
 0x13e   : > { %p2632_p0 = pnand %p2630_p13, %p3043_p8 }
 0x140   : > { %p2633_p1 = pneg %p2632_p0 }
 0x142   : > { %p2638_p2 = pnand %p2636_p3, %p2633_p1 }
 0x144   : > { %2641 = shalt.err (!%p2638_p2)
}
 0x145   : > { %s2642_s19 = scalar_lea.vmem %s550_s18, 512  ;;  %p2650_p4 = scmp.lt.s32.totalorder %s550_s18, %s550_s18 }
 0x146   : > { %p2643_p5 = scmp.ne.s32.totalorder %s550_s18, %s2642_s19  ;;  %p2651_p10 = scmp.lt.s32.totalorder %s2642_s19, %s2642_s19 }
 0x148   : > { %p2645_p7 = pnand %p2643_p5, %p3043_p8  ;;  %p2652_p11 = por %p2651_p10, %p2650_p4 }
 0x14a   : > { %p2646_p9 = pneg %p2645_p7 }
 0x14c   : > { %p2653_p12 = pnand %p2652_p11, %p2646_p9 }
 0x14e   : > { %2656 = shalt.err (!%p2653_p12)
}
 0x14f   : > { %2181 = dma.hbm_to_vmem [thread:$0]  (!%p3027_p6), %s3638_s12, 512, %s550_s18, [#allocation21], %s3681_s20, %s3681_s20, %s2881_s1  }
 0x150   : > { %s2657_s28 = scalar_lea.hbm %s3640_s14, 16 }
 0x151   : > { %p2658_p13 = scmp.ne.s32.totalorder %s3640_s14, %s2657_s28  ;;  %p2664_p3 = scmp.lt.u32.totalorder %s2657_s28, %s3640_s14 }
 0x153   : > { %p2660_p0 = pnand %p2658_p13, %p3043_p8 }
 0x155   : > { %p2661_p1 = pneg %p2660_p0 }
 0x157   : > { %p2666_p2 = pnand %p2664_p3, %p2661_p1 }
 0x159   : > { %2669 = shalt.err (!%p2666_p2)
}
 0x15a   : > { %s2670_s22 = scalar_lea.vmem %s575_s23, 16  ;;  %s2677_s1 = scalar_lea.vmem %s575_s23, 32 }
 0x15b   : > { %p2671_p5 = scmp.ne.s32.totalorder %s575_s23, %s2670_s22  ;;  %p2678_p4 = scmp.lt.s32.totalorder %s575_s23, %s575_s23 }
 0x15c   : > { %p2679_p10 = scmp.lt.s32.totalorder %s2677_s1, %s2670_s22 }
 0x15d   : > { %p2673_p7 = pnand %p2671_p5, %p3043_p8 }
 0x15e   : > { %p2680_p11 = por %p2679_p10, %p2678_p4 }
 0x15f   : > { %p2674_p9 = pneg %p2673_p7 }
 0x161   : > { %p2681_p12 = pnand %p2680_p11, %p2674_p9 }
 0x163   : > { %2684 = shalt.err (!%p2681_p12)
}
 0x164   : > { %2187 = dma.hbm_to_vmem [thread:$0]  (!%p3027_p6), %s3640_s14, 16, %s575_s23, [#allocation24]  }
 0x165   : > { %s2892_s19 = smov [#allocation26]   ;;  %s2685_s25 = scalar_lea.hbm %s3641_s15, 16 }
 0x166   : > { %s585_s17 = sshll.u32 %s2892_s19, 4  ;;  %p2686_p13 = scmp.ne.s32.totalorder %s3641_s15, %s2685_s25  ;;  %s586_s17 = int_to_ptr.vmem [resolvable:$true] %s585_s17 }
 0x167   : > { %p2692_p3 = scmp.lt.u32.totalorder %s2685_s25, %s3641_s15 }
 0x168   : > { %p2688_p0 = pnand %p2686_p13, %p3043_p8 }
 0x16a   : > { %p2689_p1 = pneg %p2688_p0 }
 0x16c   : > { %p2694_p2 = pnand %p2692_p3, %p2689_p1 }
 0x16e   : > { %2697 = shalt.err (!%p2694_p2)
}
 0x16f   : > { %s2698_s23 = scalar_lea.vmem %s586_s17, 16  ;;  %s2705_s21 = scalar_lea.vmem %s586_s17, 32 }
 0x170   : > { %p2699_p5 = scmp.ne.s32.totalorder %s586_s17, %s2698_s23  ;;  %p2706_p4 = scmp.lt.s32.totalorder %s586_s17, %s586_s17 }
 0x171   : > { %p2707_p10 = scmp.lt.s32.totalorder %s2705_s21, %s2698_s23 }
 0x172   : > { %p2701_p7 = pnand %p2699_p5, %p3043_p8 }
 0x173   : > { %p2708_p11 = por %p2707_p10, %p2706_p4 }
 0x174   : > { %p2702_p9 = pneg %p2701_p7 }
 0x176   : > { %p2709_p12 = pnand %p2708_p11, %p2702_p9 }
 0x178   : > { %2712 = shalt.err (!%p2709_p12)
}
 0x179   : > { %s3684_s20 = sld [smem:[#allocation42_spill]]  ;;  %s3685_s18 = sld [smem:[#allocation41_spill]] }
 0x17a   : > { %s3686_s29 = sld [smem:[#allocation40_spill]]  ;;  %s3687_s19 = sld [smem:[#allocation43_spill]] }
 0x17b   : > { %2190 = dma.hbm_to_vmem [thread:$0]  (!%p3027_p6), %s3641_s15, 16, %s586_s17, [#allocation27]  }
 0x17c   : > { %s1884_s30 = sadd.s32 4294967294, %s2875_s24   ;;  %s3327_s0 = sadd.s32 1, %s2875_s24  }
 0x17d   : > { %s46_s2 = ssub.s32 %s2875_s24, %s3327_s0  ;;  %p57_p0 = scmp.eq.s32.totalorder %s2875_s24, 0 }
 0x17e   : > { %p47_p8 = scmp.eq.s32.totalorder %s46_s2, 0  ;;  %p412_p7 = scmp.eq.s32.totalorder %s1884_s30, 1 }
 0x17f   : > { %s49_s25 = sadd.s32 1, %s3684_s20  ;;  %p56_p13 = scmp.ne.s32.totalorder %s3684_s20, %s3685_s18 }
 0x180   : > { %p62_p1 = scmp.ne.s32.totalorder %s3685_s18, %s3686_s29  ;;  %p3689_p2 = scmp.eq.s32.totalorder %s3687_s19, 0 }
 0x181   : > { %s3338_s28 = scalar_select %p47_p8, %s3684_s20, %s49_s25  }
 0x182   : > { %p3340_p3 = por %p57_p0, %p56_p13  ;;  %p3346_p6 = por %p3689_p2, %p62_p1 }
 0x183   : > { %p406_p5 = scmp.eq.s32.totalorder %s3687_s19, 1  ;;  %p2216_p9 = scmp.lt.s32.totalorder %s2875_s24, 2 }
 0x184   : > { %s3690_s17 = scalar_select %p3346_p6, 1, 0 }
 0x185   : > { %s596_s16 = sand.u32 1, %s3684_s20   ;;  %p3353_p4 = por %p406_p5, %p56_p13 }
 0x186   : > { %p3357_p10 = por %p412_p7, %p62_p1  ;;  %s3361_s21 = sshll.u32 %s596_s16, 3 }
 0x187   : > { %s3691_s26 = scalar_select %p3353_p4, 1, 0 }
 0x188   : > { %s3692_s23 = scalar_select %p3357_p10, 1, 0 }
 0x189   : > { %s1902_s22 = sshll.u32 %s2875_s24, 7  ;;  %s3693_s29 = sld [smem:[#allocation45_spill]] }
 0x18a   : > { %s600_s20 = scalar_lea.vmem [#allocation2], %s3361_s21  ;;  %p3374_p11 = pnand %p2216_p9, %p3340_p3 }
 0x18b   : > { %s607_s19 = sshll.u32 %s600_s20, 4  ;;  %s3695_s4 = sld [smem:[#allocation46_spill]]  ;;  %s3370_s19 = int_to_ptr.vmem [resolvable:$true] %s607_s19 }
 0x18c   : > { %s614_s18 = sand.u32 1, %s2875_s24   ;;  %s597_s5 = scalar_lea.sflag [#allocation3], %s596_s16 }
 0x18d   : > { %p2715_p8 = pneg %p3374_p11 }
 0x18f   : > { %s3367_s2 = scalar_lea.hbm %s3693_s29, %s1902_s22  ;;  %s2718_s7 = scalar_lea.hbm %s3693_s29, 256 }
 0x190   : > { %s2713_s6 = scalar_lea.hbm %s3367_s2, 128  ;;  %p2719_p1 = scmp.lt.u32.totalorder %s3367_s2, %s3693_s29 }
 0x191   : > { %s3381_s1 = scalar_lea.hbm %s3695_s4, %s1902_s22  ;;  %p2714_p12 = scmp.ne.s32.totalorder %s3367_s2, %s2713_s6 }
 0x192   : > { %p2720_p3 = scmp.lt.u32.totalorder %s2718_s7, %s2713_s6  ;;  %p2722_p5 = scmp.lt.u32.totalorder %s2713_s6, %s3367_s2 }
 0x193   : > { %p2716_p13 = pnand %p2715_p8, %p2714_p12 }
 0x194   : > { %p2721_p2 = por %p2720_p3, %p2719_p1 }
 0x195   : > { %p2717_p0 = pneg %p2716_p13 }
 0x196   : > { %p2723_p7 = por %p2722_p5, %p2721_p2 }
 0x198   : > { %p2724_p9 = pnand %p2723_p7, %p2717_p0 }
 0x19a   : > { %2727 = shalt.err (!%p2724_p9)
}
 0x19b   : > { %s2728_s16 = scalar_lea.vmem %s3370_s19, 128  ;;  %s2893_s22 = smov [#allocation2]  }
 0x19c   : > { %p2729_p12 = scmp.ne.s32.totalorder %s3370_s19, %s2728_s16  ;;  %s2733_s25 = sshll.u32 %s2893_s22, 4  ;;  %s2734_s25 = int_to_ptr.vmem [resolvable:$false] %s2733_s25 }
 0x19d   : > { %s2735_s8 = scalar_lea.vmem %s2734_s25, 256  ;;  %p2736_p4 = scmp.lt.s32.totalorder %s3370_s19, %s2734_s25 }
 0x19e   : > { %p2731_p13 = pnand %p2729_p12, %p2715_p8  ;;  %p2737_p1 = scmp.lt.s32.totalorder %s2735_s8, %s2728_s16 }
 0x1a0   : > { %p2732_p10 = pneg %p2731_p13  ;;  %p2738_p3 = por %p2737_p1, %p2736_p4 }
 0x1a2   : > { %p2739_p2 = pnand %p2738_p3, %p2732_p10 }
 0x1a4   : > { %2742 = shalt.err (!%p2739_p2)
}
 0x1a5   : > { %2194 = dma.hbm_to_vmem [thread:$0]  (!%p3374_p11), %s3367_s2, 128, %s3370_s19, %s597_s5  }
 0x1a6   : > { %s618_s6 = scalar_lea.vmem [#allocation5], %s3361_s21  ;;  %s615_s27 = scalar_lea.sflag [#allocation6], %s614_s18 }
 0x1a7   : > { %s625_s7 = sshll.u32 %s618_s6, 4  ;;  %s2743_s20 = scalar_lea.hbm %s3381_s1, 128  ;;  %s626_s7 = int_to_ptr.vmem [resolvable:$true] %s625_s7 }
 0x1a8   : > { %p2744_p4 = scmp.ne.s32.totalorder %s3381_s1, %s2743_s20  ;;  %s2748_s22 = scalar_lea.hbm %s3695_s4, 256 }
 0x1a9   : > { %p2749_p5 = scmp.lt.u32.totalorder %s3381_s1, %s3695_s4  ;;  %p2750_p7 = scmp.lt.u32.totalorder %s2748_s22, %s2743_s20 }
 0x1aa   : > { %p2746_p10 = pnand %p2744_p4, %p2715_p8  ;;  %p2752_p12 = scmp.lt.u32.totalorder %s2743_s20, %s3381_s1 }
 0x1ab   : > { %p2751_p9 = por %p2750_p7, %p2749_p5 }
 0x1ac   : > { %p2747_p0 = pneg %p2746_p10 }
 0x1ad   : > { %p2753_p13 = por %p2752_p12, %p2751_p9 }
 0x1af   : > { %p2754_p1 = pnand %p2753_p13, %p2747_p0 }
 0x1b1   : > { %2757 = shalt.err (!%p2754_p1)
}
 0x1b2   : > { %s2758_s5 = scalar_lea.vmem %s626_s7, 128  ;;  %s2894_s21 = smov [#allocation5]  }
 0x1b3   : > { %p2759_p3 = scmp.ne.s32.totalorder %s626_s7, %s2758_s5  ;;  %s2763_s2 = sshll.u32 %s2894_s21, 4  ;;  %s2764_s2 = int_to_ptr.vmem [resolvable:$false] %s2763_s2 }
 0x1b4   : > { %s2765_s19 = scalar_lea.vmem %s2764_s2, 256  ;;  %p2766_p10 = scmp.lt.s32.totalorder %s626_s7, %s2764_s2 }
 0x1b5   : > { %p2761_p2 = pnand %p2759_p3, %p2715_p8  ;;  %p2767_p6 = scmp.lt.s32.totalorder %s2765_s19, %s2758_s5 }
 0x1b7   : > { %p2762_p4 = pneg %p2761_p2  ;;  %p2768_p5 = por %p2767_p6, %p2766_p10 }
 0x1b9   : > { %p2769_p7 = pnand %p2768_p5, %p2762_p4 }
 0x1bb   : > { %2772 = shalt.err (!%p2769_p7)
}
 0x1bc   : > { %2197 = dma.hbm_to_vmem [thread:$0]  (!%p3374_p11), %s3381_s1, 128, %s626_s7, %s615_s27  }
 0x1bd   : > { %s3696_s18 = sld [smem:[#allocation44_spill]] }
 0x1c3   : > { %p3697_p0 = scmp.ne.s32.totalorder %s3696_s18, 0 }
 0x1c4   : > { %s3698_s6 = sld [smem:[#allocation41_spill]] (!%p3697_p0)  ;;  %p3699_p6 = scmp.ne.s32.totalorder (!%p3697_p0), %s3690_s17, 0 }
 0x1c5   : > { %634 = sbr.rel (%p3697_p0) target bundleno = 2678 (0xa76), region = 84 }
 0x1ca   : > { %s3434_s20 = sand.u32 (!%p3697_p0), 1, %s3698_s6  }
 0x1cb   : > { %s3437_s3 = sshll.u32 (!%p3697_p0), %s3434_s20, 3  ;;  %s637_s16 = scalar_lea.sflag (!%p3697_p0), [#allocation3], %s3434_s20 }
 0x1cc   : > { %s640_s22 = scalar_lea.vmem [#allocation2], %s3437_s3 }
 0x1cd   : > { %2818 = dma.done.wait (%p3699_p6), %s637_s16, 128  }
 0x1ce   : > { %2820 = vsyncadd (%p3699_p6), %s637_s16, 4294967168  ;;  %s3700_s30 = sld [smem:[#allocation43_spill]]  ;;  %s649_s27 = scalar_lea.vmem [#allocation5], %s3437_s3 }
 0x1d4   : > { %s645_s1 = sand.u32 1, %s3700_s30  }
 0x1d5   : > { %s646_s7 = scalar_lea.sflag [#allocation6], %s645_s1 }
 0x1d6   : > { %2822 = dma.done.wait (%p3699_p6), %s646_s7, 128  }
 0x1d7   : > { %2824 = vsyncadd (%p3699_p6), %s646_s7, 4294967168  ;;  %p3701_p11 = scmp.eq.s32.totalorder %s3700_s30, 0 }
 0x1d9   : > { %2826 = dma.done.wait (%p3701_p11), [#allocation6], 256   ;;  %p3702_p8 = pmov %p3701_p11 }
 0x1db   : > { %2828 = vsyncadd (%p3702_p8), [#allocation6], 4294967040  ;;  %p3703_p9 = pmov %p3702_p8 }
 0x1dc   : > { %p3704_p12 = pmov %p3702_p8 }
 0x1dd   : > { %2830 = dma.done.wait (%p3703_p9), [#allocation9], 272  }
 0x1de   : > { %2832 = vsyncadd (%p3704_p12), [#allocation9], 4294967024  ;;  %p3705_p13 = pmov %p3702_p8 }
 0x1df   : > { %p3706_p1 = pmov %p3702_p8 }
 0x1e0   : > { %2834 = dma.done.wait (%p3705_p13), [#allocation12], 272  }
 0x1e1   : > { %2836 = vsyncadd (%p3706_p1), [#allocation12], 4294967024  ;;  %p3707_p3 = pmov %p3706_p1 }
 0x1e2   : > { %p3708_p2 = pmov %p3706_p1 }
 0x1e3   : > { %2838 = dma.done.wait (%p3707_p3), [#allocation15], 32  }
 0x1e4   : > { %2840 = vsyncadd (%p3708_p2), [#allocation15], 4294967264  ;;  %p3709_p4 = pmov %p3706_p1 }
 0x1e5   : > { %p3710_p10 = pmov %p3706_p1 }
 0x1e6   : > { %2842 = dma.done.wait (%p3709_p4), [#allocation18], 272  }
 0x1e7   : > { %2844 = vsyncadd (%p3710_p10), [#allocation18], 4294967024  ;;  %p3711_p5 = pmov %p3706_p1 }
 0x1e8   : > { %p3712_p7 = pmov %p3706_p1 }
 0x1e9   : > { %2846 = dma.done.wait (%p3711_p5), [#allocation21], 528  }
 0x1ea   : > { %2848 = vsyncadd (%p3712_p7), [#allocation21], 4294966768  ;;  %p3713_p0 = pmov %p3706_p1 }
 0x1ec   : > { %2850 = dma.done.wait (%p3713_p0), [#allocation24], 32   ;;  %p3714_p6 = pmov %p3713_p0 }
 0x1ed   : > { %p3715_p11 = pmov %p3713_p0 }
 0x1ee   : > { %2852 = vsyncadd (%p3714_p6), [#allocation24], 4294967264 }
 0x1ef   : > { %2854 = dma.done.wait (%p3715_p11), [#allocation27], 16   ;;  %p3716_p8 = pmov %p3713_p0 }
 0x1f0   : > { %v2895_v0 = vmov 0.0   ;;  %vm2896_vm0 = vmmov 0   ;;  %v2289_v1 = vld [vmem:[#allocation7] sm:$0xff]   ;;  %v2290_v2 = vld [vmem:[#allocation7 + $0x8] sm:$0xff]   ;;  %v761_v4 = vld [vmem:[%s649_s27] sm:$0xff]  ;;  %vm788_vm1 = vcmask 261120  }
 0x1f1   : > { %2856 = vsyncadd (%p3716_p8), [#allocation27], 4294967280  ;;  %1994 = vmatprep.subr.bf16.mxu1 %v2895_v0  ;;  %1998 = vmatprep.mubr.msk.bf16.mxu1 %vm2896_vm0, %v2895_v0  ;;  %v3491_v3 = vld [vmem:[%s640_s22] sm:$0xff]  ;;  %v1923_v7 = vld [vmem:[#allocation8] ss:$0 sm:$0xff]  ;;  %s2897_s17 = smov 104  }
 0x1f2   : > { %2010 = vmatprep.subr.bf16.mxu0 %v2895_v0  ;;  %2012 = vmatprep.mubr.msk.bf16.mxu0 %vm2896_vm0, %v2895_v0  ;;  %v763_v5 = vadd.f32 %v761_v4, %v3491_v3  ;;  %v2291_v14 = vld [vmem:[#allocation10] sm:$0xff]   ;;  %s2898_s25 = smov 120   ;;  %v2292_v15 = vld [vmem:[#allocation10 + $0x8] sm:$0xff]   ;;  %s2899_s8 = smov 96   ;;  %v762_v16 = vpack.c.bf16 %v3491_v3, %v3491_v3  ;;  %vm916_vm2 = vcmask 64512   ;;  %vm1150_vm3 = vcmask 1043456  }
 0x1f3   : > { %1995 = vmatpush3.bf16.msra.mxu1 %v2289_v1  ;;  %s2900_s5 = smov 112   ;;  %v1927_v27 = vld [vmem:[#allocation11] ss:$0 sm:$0xff]  ;;  %s2901_s21 = smov 8   ;;  %vm1353_vm4 = vcmask 130048   ;;  %vm1355_vm5 = vcmask 195584  }
 0x1f4   : > { %1996 = vmatprep.subr.bf16.mxu1 %v2895_v0  ;;  %v764_v6 = vpack.c.bf16 %v763_v5, %v763_v5  ;;  %s2902_s2 = smov 16   ;;  %s2903_s19 = smov 24   ;;  %vm1566_vm6 = vcmask 523264  }
 0x1f5   : > { %s1958_s18 = sshll.u32 %s3700_s30, 7  ;;  %s758_s6 = scalar_lea.vmem [#allocation28], %s3437_s3 }
 0x1f6   : > { %s1658_s16 = sshll.u32 %s758_s6, 4  ;;  %s3717_s7 = sld [smem:[#allocation54_spill]]  ;;  %s3583_s16 = int_to_ptr.vmem [resolvable:$true] %s1658_s16 }
 0x1f7   : > { %1997 = vmatpush3.bf16.msra.mxu1 %v2290_v2  ;;  %p3718_p12 = scmp.ne.s32.totalorder %s3691_s26, 0  ;;  %s2904_s3 = smov [#allocation28]  }
 0x1f8   : > { %2002 = vmatprep.subr.bf16.mxu1 %v2895_v0  ;;  %s2777_s30 = sshll.u32 %s2904_s3, 4  ;;  %s2778_s30 = int_to_ptr.vmem [resolvable:$false] %s2777_s30 }
 0x1f9   : > { %p2780_p3 = scmp.lt.s32.totalorder %s3583_s16, %s2778_s30 }
 0x1fa   : > { %1999 = vmatmul.mubr.msk.bf16.vlgmr.msra.gmra.mrb[0].mxu1 %vm788_vm1, %v764_v6 }
 0x1fb   : > { %2006 = vmatprep.mubr.msk.bf16.mxu1 %vm2896_vm0, %v2895_v0  ;;  %2003 = vmatpush3.bf16.msra.mxu1 %v2291_v14 }
 0x1fc   : > { %2004 = vmatprep.subr.bf16.mxu1 %v2895_v0  ;;  %s3581_s27 = scalar_lea.hbm %s3717_s7, %s1958_s18 }
 0x1ff   : > { %2005 = vmatpush3.bf16.msra.mxu1 %v2292_v15 }
 0x200   : > { %2016 = vmatprep.subr.bf16.mxu1 %v2895_v0 }
 0x202   : > { %2007 = vmatmul.mubr.msk.bf16.vlgmr.msra.gmra.mrb[4].mxu1 %vm788_vm1, %v762_v16 }
 0x203   : > { %2018 = vmatprep.mubr.msk.bf16.mxu1 %vm2896_vm0, %v2895_v0 }
 0x2cd   : > { %v826_v8 = vpop.f32.mrb[0].mxu1 }
 0x2ce   : > { %v827_v9 = vadd.f32 %v1923_v7, %v826_v8  ;;  %v2000_v10 = vpop.f32.mrb[1].mxu1 }
 0x2cf   : > { %v829_v11 = vpop.f32.mrb[2].mxu1 }
 0x2d0   : > { %v898_v12 = vpack.c.bf16 %v827_v9, %v827_v9  ;;  %v2001_v13 = vpop.f32.mrb[3].mxu1 }
 0x2d2   : > { %905 = vrot.lane.b32.xlu1 %v898_v12, %s2897_s17  ;;  %901 = vrot.lane.b32.xlu0 %v898_v12, %s2898_s25 }
 0x2d5   : > { %v892_v22 = vpop.f32.mrb[4].mxu1 }
 0x2d6   : > { %914 = vrot.lane.b32.xlu1 %v898_v12, %s2899_s8  ;;  %903 = vrot.lane.b32.xlu0 %v898_v12, %s2900_s5  ;;  %v2008_v23 = vpop.f32.mrb[5].mxu1  ;;  %v893_v29 = vadd.f32 %v1927_v27, %v892_v22 }
 0x2d7   : > { %v895_v24 = vpop.f32.mrb[6].mxu1 }
 0x2d8   : > { %v2009_v25 = vpop.f32.mrb[7].mxu1  ;;  %v899_v33 = vpack.c.bf16 %v893_v29, %v893_v29 }
 0x2da   : > { %v1152_v35 = vsel %vm1150_vm3, %v899_v33, 0 }
 0x344   : > { %v906_v17 = vpop.permute.xlu1 %905  ;;  %v902_v18 = vpop.permute.xlu0 %901 }
 0x345   : > { %963 = vrot.lane.b32.xlu0 %v902_v18, %s2899_s8 }
 0x348   : > { %v915_v19 = vpop.permute.xlu1 %914  ;;  %v904_v20 = vpop.permute.xlu0 %903 }
 0x349   : > { %1059 = vrot.lane.b32.xlu0 %v906_v17, %s2899_s8  ;;  %1011 = vrot.lane.b32.xlu1 %v904_v20, %s2899_s8  ;;  %v921_v21 = vsel %vm916_vm2, %v915_v19, 0  ;;  %s2779_s8 = scalar_lea.vmem %s2778_s30, 256 }
 0x34a   : > { %2011 = vmatpush3.bf16.xpose.msra.mxu0 %v921_v21 }
 0x34b   : > { %2022 = vmatprep.subr.bf16.mxu0 %v2895_v0 }
 0x351   : > { %2013 = vmatmul.mubr.msk.bf16.vlgmr.msra.gmra.mrb[0].mxu0 %vm916_vm2, %v898_v12 }
 0x352   : > { %2024 = vmatprep.mubr.msk.bf16.mxu0 %vm2896_vm0, %v2895_v0 }
 0x3b7   : > { %v964_v26 = vpop.permute.xlu0 %963 }
 0x3b8   : > { %v969_v28 = vsel %vm916_vm2, %v964_v26, 0 }
 0x3b9   : > { %2017 = vmatpush3.bf16.xpose.msra.mxu1 %v969_v28 }
 0x3ba   : > { %2028 = vmatprep.subr.bf16.mxu1 %v2895_v0 }
 0x3bb   : > { %v1012_v30 = vpop.permute.xlu1 %1011  ;;  %v1060_v32 = vpop.permute.xlu0 %1059 }
 0x3bc   : > { %v1017_v31 = vsel %vm916_vm2, %v1012_v30, 0  ;;  %v1065_v34 = vsel %vm916_vm2, %v1060_v32, 0  ;;  %v2293_v30 = vld [vmem:[#allocation13] sm:$0xff]   ;;  %v2294_v32 = vld [vmem:[#allocation13 + $0x8] sm:$0xff]  }
 0x3bd   : > { %2023 = vmatpush3.bf16.xpose.msra.mxu0 %v1017_v31 }
 0x3be   : > { %2034 = vmatprep.subr.bf16.mxu0 %v2895_v0 }
 0x3c0   : > { %2019 = vmatmul.mubr.msk.bf16.vlgmr.msra.gmra.mrb[8].mxu1 %vm916_vm2, %v902_v18 }
 0x3c1   : > { %2029 = vmatpush3.bf16.xpose.msra.mxu1 %v1065_v34  ;;  %2030 = vmatprep.mubr.msk.bf16.mxu1 %vm2896_vm0, %v2895_v0 }
 0x3c2   : > { %2040 = vmatprep.subr.bf16.mxu1 %v2895_v0 }
 0x3c4   : > { %2025 = vmatmul.mubr.msk.bf16.vlgmr.msra.gmra.mrb[4].mxu0 %vm916_vm2, %v904_v20 }
 0x3c5   : > { %2035 = vmatpush3.bf16.msra.mxu0 %v1152_v35  ;;  %2036 = vmatprep.mubr.msk.bf16.mxu0 %vm2896_vm0, %v2895_v0 }
 0x3c6   : > { %2046 = vmatprep.subr.bf16.mxu0 %v2895_v0 }
 0x3c8   : > { %2031 = vmatmul.mubr.msk.bf16.vlgmr.msra.gmra.mrb[12].mxu1 %vm916_vm2, %v906_v17 }
 0x3c9   : > { %2042 = vmatprep.mubr.msk.bf16.mxu1 %vm2896_vm0, %v2895_v0 }
 0x424   : > { %v957_v36 = vpop.f32.mrb[0].mxu0 }
 0x425   : > { %v2014_v37 = vpop.f32.mrb[1].mxu0  ;;  %v1107_v38 = vsel %vm916_vm2, %v957_v36, -inf }
 0x426   : > { %v960_v39 = vpop.f32.mrb[2].mxu0  ;;  %1108 = vmax.xlane.f32.xlu1 %v1107_v38 }
 0x427   : > { %v2015_v40 = vpop.f32.mrb[3].mxu0 }
 0x437   : > { %910 = vrot.lane.b32.xlu1 %v899_v33, %s2900_s5 }
 0x493   : > { %v1005_v41 = vpop.f32.mrb[8].mxu1 }
 0x494   : > { %v2020_v42 = vpop.f32.mrb[9].mxu1  ;;  %v1110_v43 = vsel %vm916_vm2, %v1005_v41, -inf }
 0x495   : > { %1111 = vmax.xlane.f32.xlu0 %v1110_v43  ;;  %v1008_v44 = vpop.f32.mrb[10].mxu1 }
 0x496   : > { %v2021_v45 = vpop.f32.mrb[11].mxu1 }
 0x497   : > { %v1053_v46 = vpop.f32.mrb[4].mxu0 }
 0x498   : > { %v2026_v47 = vpop.f32.mrb[5].mxu0  ;;  %v1113_v48 = vsel %vm916_vm2, %v1053_v46, -inf }
 0x499   : > { %v1056_v49 = vpop.f32.mrb[6].mxu0  ;;  %1114 = vmax.xlane.f32.xlu0 %v1113_v48 }
 0x49a   : > { %v2027_v50 = vpop.f32.mrb[7].mxu0 }
 0x49b   : > { %v1101_v51 = vpop.f32.mrb[12].mxu1 }
 0x49c   : > { %v2032_v52 = vpop.f32.mrb[13].mxu1  ;;  %v1116_v53 = vsel %vm916_vm2, %v1101_v51, -inf }
 0x49d   : > { %1117 = vmax.xlane.f32.xlu1 %v1116_v53  ;;  %v1104_v54 = vpop.f32.mrb[14].mxu1 }
 0x49e   : > { %v2033_v55 = vpop.f32.mrb[15].mxu1 }
 0x4ae   : > { %912 = vrot.lane.b32.xlu1 %v899_v33, %s2897_s17  ;;  %s1645_s17 = scalar_lea.sflag [#allocation4], %s3434_s20 }
 0x4af   : > { %908 = vrot.lane.b32.xlu0 %v899_v33, %s2898_s25  ;;  %s2773_s25 = scalar_lea.vmem %s3583_s16, 128 }
 0x4b0   : > { %p2774_p9 = scmp.ne.s32.totalorder %s3583_s16, %s2773_s25  ;;  %p2781_p2 = scmp.lt.s32.totalorder %s2779_s8, %s2773_s25 }
 0x4b2   : > { %p2775_p13 = pnand %p2774_p9, %p3718_p12  ;;  %p2782_p4 = por %p2781_p2, %p2780_p3 }
 0x4b3   : > { %v1109_v56 = vpop.xlane.xlu1 %1108 }
 0x4b4   : > { %v1119_v57 = vsub.f32 %v957_v36, %v1109_v56  ;;  %p2776_p1 = pneg %p2775_p13 }
 0x4b6   : > { %v1123_v58 = vmul.f32 1.442695, %v1119_v57  ;;  %p2783_p10 = pnand %p2782_p4, %p2776_p1 }
 0x4b7   : > { %v911_v59 = vpop.permute.xlu1 %910 }
 0x4b8   : > { %2301 = vpow2.f32 %v1123_v58  ;;  %v1244_v62 = vsel %vm1150_vm3, %v911_v59, 0 }
 0x4c2   : > { %v2302_v60 = vpop.eup %2301 }
 0x4c3   : > { %v1143_v61 = vpack.c.bf16 %v2302_v60, %v2302_v60  ;;  %v1131_v23 = vsel %vm916_vm2, %v2302_v60, 0.0 }
 0x4c5   : > { %2037 = vmatmul.mubr.msk.bf16.vlgmr.msra.gmra.mrb[8].mxu0 %vm916_vm2, %v1143_v61  ;;  %v1939_v61 = vld [vmem:[#allocation14] ss:$0 sm:$0xff] }
 0x4c6   : > { %2047 = vmatpush3.bf16.msra.mxu0 %v1244_v62  ;;  %2048 = vmatprep.mubr.msk.bf16.mxu0 %vm2896_vm0, %v2895_v0 }
 0x4c7   : > { %2058 = vmatprep.subr.bf16.mxu0 %v2895_v0 }
 0x522   : > { %v1112_v63 = vpop.xlane.xlu0 %1111 }
 0x523   : > { %v1120_v1 = vsub.f32 %v1005_v41, %v1112_v63 }
 0x525   : > { %v1125_v2 = vmul.f32 1.442695, %v1120_v1 }
 0x526   : > { %v1115_v4 = vpop.xlane.xlu0 %1114 }
 0x527   : > { %2303 = vpow2.f32 %v1125_v2  ;;  %v1121_v5 = vsub.f32 %v1053_v46, %v1115_v4 }
 0x529   : > { %v1127_v6 = vmul.f32 1.442695, %v1121_v5 }
 0x52a   : > { %v909_v7 = vpop.permute.xlu0 %908  ;;  %v1118_v8 = vpop.xlane.xlu1 %1117 }
 0x52b   : > { %2305 = vpow2.f32 %v1127_v6  ;;  %v1198_v9 = vsel %vm1150_vm3, %v909_v7, 0  ;;  %v1122_v10 = vsub.f32 %v1101_v51, %v1118_v8 }
 0x52c   : > { %2041 = vmatpush3.bf16.msra.mxu1 %v1198_v9  ;;  %v2295_v9 = vld [vmem:[#allocation19] sm:$0xff]  }
 0x52d   : > { %v1129_v11 = vmul.f32 1.442695, %v1122_v10  ;;  %2052 = vmatprep.subr.bf16.mxu1 %v2895_v0  ;;  %v2296_v10 = vld [vmem:[#allocation19 + $0x8] sm:$0xff]  }
 0x52e   : > { %v913_v13 = vpop.permute.xlu1 %912 }
 0x52f   : > { %2307 = vpow2.f32 %v1129_v11  ;;  %v1290_v16 = vsel %vm1150_vm3, %v913_v13, 0  ;;  %v2297_v11 = vld [vmem:[#allocation22] sm:$0xff]  }
 0x531   : > { %v2304_v12 = vpop.eup %2303 }
 0x532   : > { %v1134_v14 = vsel %vm916_vm2, %v2304_v12, 0.0  ;;  %v1144_v15 = vpack.c.bf16 %v2304_v12, %v2304_v12  ;;  %v2298_v12 = vld [vmem:[#allocation22 + $0x8] sm:$0xff]  }
 0x533   : > { %1135 = vadd.xlane.f32.xlu0 %v1134_v14 }
 0x534   : > { %2043 = vmatmul.mubr.msk.bf16.vlgmr.msra.gmra.mrb[16].mxu1 %vm916_vm2, %v1144_v15 }
 0x535   : > { %v2306_v17 = vpop.eup %2305  ;;  %2053 = vmatpush3.bf16.msra.mxu1 %v1290_v16  ;;  %2054 = vmatprep.mubr.msk.bf16.mxu1 %vm2896_vm0, %v2895_v0 }
 0x536   : > { %v1137_v18 = vsel %vm916_vm2, %v2306_v17, 0.0  ;;  %v1145_v19 = vpack.c.bf16 %v2306_v17, %v2306_v17  ;;  %2066 = vmatprep.subr.bf16.mxu1 %v2895_v0 }
 0x537   : > { %1138 = vadd.xlane.f32.xlu1 %v1137_v18 }
 0x538   : > { %2049 = vmatmul.mubr.msk.bf16.vlgmr.msra.gmra.mrb[12].mxu0 %vm916_vm2, %v1145_v19 }
 0x539   : > { %v2308_v20 = vpop.eup %2307  ;;  %2062 = vmatprep.mubr.msk.bf16.mxu0 %vm2896_vm0, %v2895_v0  ;;  %2059 = vmatpush3.bf16.msra.mxu0 %v2293_v30  ;;  %v1945_v30 = vld [vmem:[#allocation20] ss:$0 sm:$0xff] }
 0x53a   : > { %v1140_v21 = vsel %vm916_vm2, %v2308_v20, 0.0  ;;  %v1146_v22 = vpack.c.bf16 %v2308_v20, %v2308_v20  ;;  %2060 = vmatprep.subr.bf16.mxu0 %v2895_v0 }
 0x53b   : > { %1141 = vadd.xlane.f32.xlu0 %v1140_v21 }
 0x53c   : > { %2055 = vmatmul.mubr.msk.bf16.vlgmr.msra.gmra.mrb[20].mxu1 %vm916_vm2, %v1146_v22  ;;  %v1943_v22 = vld [vmem:[#allocation16] ss:$0 sm:$0xff] }
 0x53d   : > { %2070 = vmatprep.mubr.msk.bf16.mxu1 %vm2896_vm0, %v2895_v0  ;;  %2061 = vmatpush3.bf16.msra.mxu0 %v2294_v32 }
 0x53e   : > { %2074 = vmatprep.subr.bf16.mxu0 %v2895_v0  ;;  %2067 = vmatpush3.bf16.msra.mxu1 %v2295_v9 }
 0x53f   : > { %1132 = vadd.xlane.f32.xlu0 %v1131_v23  ;;  %2068 = vmatprep.subr.bf16.mxu1 %v2895_v0 }
 0x542   : > { %2069 = vmatpush3.bf16.msra.mxu1 %v2296_v10 }
 0x598   : > { %v1188_v24 = vpop.f32.mrb[8].mxu0 }
 0x599   : > { %v2038_v25 = vpop.f32.mrb[9].mxu0 }
 0x59a   : > { %v1191_v26 = vpop.f32.mrb[10].mxu0 }
 0x59b   : > { %v2039_v27 = vpop.f32.mrb[11].mxu0 }
 0x5c0   : > { %v1136_v28 = vpop.xlane.xlu0 %1135 }
 0x5c1   : > { %2309 = vrcp.f32 %v1136_v28  ;;  %v2299_v28 = vld [vmem:[#allocation22 + $0x10] sm:$0xff]  }
 0x5c4   : > { %v1139_v29 = vpop.xlane.xlu1 %1138 }
 0x5c5   : > { %2311 = vrcp.f32 %v1139_v29  ;;  %v2300_v29 = vld [vmem:[#allocation22 + $0x18] sm:$0xff]  }
 0x5c8   : > { %v1142_v31 = vpop.xlane.xlu0 %1141 }
 0x5c9   : > { %2313 = vrcp.f32 %v1142_v31 }
 0x5cb   : > { %v2310_v33 = vpop.eup %2309 }
 0x5cc   : > { %v1133_v51 = vpop.xlane.xlu0 %1132 }
 0x5cd   : > { %2315 = vrcp.f32 %v1133_v51 }
 0x5cf   : > { %v2312_v39 = vpop.eup %2311 }
 0x5d3   : > { %v2314_v45 = vpop.eup %2313 }
 0x5d7   : > { %v2316_v52 = vpop.eup %2315 }
 0x5d8   : > { %v1336_v54 = vmul.f32 %v2316_v52, %v1188_v24  ;;  %v1944_v24 = vld [vmem:[#allocation17] ss:$0 sm:$0xff] }
 0x607   : > { %v1234_v34 = vpop.f32.mrb[16].mxu1 }
 0x608   : > { %v1337_v35 = vmul.f32 %v2310_v33, %v1234_v34  ;;  %v2044_v36 = vpop.f32.mrb[17].mxu1 }
 0x609   : > { %v1237_v37 = vpop.f32.mrb[18].mxu1 }
 0x60a   : > { %1341 = vrot.lane.b32.xlu1 %v1337_v35, %s2901_s21  ;;  %v2045_v38 = vpop.f32.mrb[19].mxu1 }
 0x60b   : > { %v1280_v40 = vpop.f32.mrb[12].mxu0  ;;  %v1949_v38 = vld [vmem:[#allocation23] ss:$0 sm:$0xff] }
 0x60c   : > { %v1338_v41 = vmul.f32 %v2312_v39, %v1280_v40  ;;  %v2050_v42 = vpop.f32.mrb[13].mxu0 }
 0x60d   : > { %v1283_v43 = vpop.f32.mrb[14].mxu0 }
 0x60e   : > { %v2051_v44 = vpop.f32.mrb[15].mxu0  ;;  %1345 = vrot.lane.b32.xlu0 %v1338_v41, %s2902_s2 }
 0x60f   : > { %v1326_v46 = vpop.f32.mrb[20].mxu1 }
 0x610   : > { %v1339_v47 = vmul.f32 %v2314_v45, %v1326_v46  ;;  %v2056_v48 = vpop.f32.mrb[21].mxu1 }
 0x611   : > { %v1329_v49 = vpop.f32.mrb[22].mxu1 }
 0x612   : > { %1349 = vrot.lane.b32.xlu1 %v1339_v47, %s2903_s19  ;;  %v2057_v50 = vpop.f32.mrb[23].mxu1 }
 0x67c   : > { %v1342_v53 = vpop.permute.xlu1 %1341 }
 0x67d   : > { %v1352_v56 = vsel %vm916_vm2, %v1336_v54, %v1342_v53 }
 0x680   : > { %v1346_v55 = vpop.permute.xlu0 %1345 }
 0x681   : > { %v1354_v57 = vsel %vm1353_vm4, %v1352_v56, %v1346_v55 }
 0x684   : > { %v1350_v58 = vpop.permute.xlu1 %1349 }
 0x685   : > { %v1356_v59 = vsel %vm1355_vm5, %v1354_v57, %v1350_v58  ;;  %v1955_v57 = vld [vmem:[#allocation25] ss:$0 sm:$0xff] }
 0x686   : > { %v1357_v60 = vpack.c.bf16 %v1356_v59, %v1356_v59  ;;  %v1956_v59 = vld [vmem:[#allocation26] ss:$0 sm:$0xff] }
 0x688   : > { %2063 = vmatmul.mubr.msk.bf16.vlgmr.msra.gmra.mrb[16].mxu0 %vm788_vm1, %v1357_v60 }
 0x689   : > { %2082 = vmatprep.mubr.msk.bf16.mxu0 %vm2896_vm0, %v2895_v0  ;;  %2075 = vmatpush3.bf16.msra.mxu0 %v2297_v11 }
 0x68a   : > { %2076 = vmatprep.subr.bf16.mxu0 %v2895_v0 }
 0x68d   : > { %2077 = vmatpush3.bf16.msra.mxu0 %v2298_v12 }
 0x68e   : > { %2078 = vmatprep.subr.bf16.mxu0 %v2895_v0 }
 0x691   : > { %2079 = vmatpush3.bf16.msra.mxu0 %v2299_v28 }
 0x692   : > { %2080 = vmatprep.subr.bf16.mxu0 %v2895_v0 }
 0x695   : > { %2081 = vmatpush3.bf16.msra.mxu0 %v2300_v29 }
 0x75b   : > { %v1418_v62 = vpop.f32.mrb[16].mxu0 }
 0x75c   : > { %v1419_v63 = vadd.f32 %v1939_v61, %v1418_v62  ;;  %v2064_v1 = vpop.f32.mrb[17].mxu0 }
 0x75d   : > { %v1421_v2 = vpop.f32.mrb[18].mxu0 }
 0x75e   : > { %v1424_v4 = vadd.f32 %v1419_v63, %v3491_v3  ;;  %v2065_v5 = vpop.f32.mrb[19].mxu0 }
 0x760   : > { %v1427_v6 = vsel %vm788_vm1, %v1424_v4, 0.0  ;;  %v1432_v7 = vmul.f32 %v1424_v4, %v1424_v4 }
 0x761   : > { %1428 = vadd.xlane.f32.xlu1 %v1427_v6 }
 0x762   : > { %v1433_v8 = vsel %vm788_vm1, %v1432_v7, 0.0 }
 0x763   : > { %1434 = vadd.xlane.f32.xlu0 %v1433_v8 }
 0x7ee   : > { %v1429_v3 = vpop.xlane.xlu1 %1428 }
 0x7ef   : > { %v1431_v13 = vmul.f32 0.03125, %v1429_v3 }
 0x7f0   : > { %v1435_v14 = vpop.xlane.xlu0 %1434 }
 0x7f1   : > { %v1437_v15 = vmul.f32 %v1431_v13, %v1431_v13  ;;  %v1436_v16 = vmul.f32 0.03125, %v1435_v14  ;;  %v1440_v20 = vsub.f32 %v1424_v4, %v1431_v13 }
 0x7f3   : > { %v1438_v17 = vsub.f32 %v1436_v16, %v1437_v15 }
 0x7f5   : > { %v1439_v18 = vmax.f32 %v1438_v17, 0.0 }
 0x7f7   : > { %v1441_v19 = vadd.f32 1e-05, %v1439_v18 }
 0x7f9   : > { %2317 = vrsqrt.f32 %v1441_v19 }
 0x803   : > { %v2318_v21 = vpop.eup %2317 }
 0x804   : > { %v1443_v23 = vmul.f32 %v2318_v21, %v1440_v20 }
 0x806   : > { %v1450_v25 = vmul.f32 %v1943_v22, %v1443_v23 }
 0x808   : > { %v1457_v26 = vadd.f32 %v1944_v24, %v1450_v25 }
 0x80a   : > { %v1458_v27 = vpack.c.bf16 %v1457_v26, %v1457_v26 }
 0x80c   : > { %2071 = vmatmul.mubr.msk.bf16.vlgmr.msra.gmra.mrb[24].mxu1 %vm788_vm1, %v1458_v27 }
 0x8df   : > { %v1519_v31 = vpop.f32.mrb[24].mxu1 }
 0x8e0   : > { %v1520_v32 = vadd.f32 %v1945_v30, %v1519_v31  ;;  %v2072_v33 = vpop.f32.mrb[25].mxu1 }
 0x8e1   : > { %v1522_v34 = vpop.f32.mrb[26].mxu1 }
 0x8e2   : > { %v1525_v35 = vmax.f32 %v1520_v32, 0.0  ;;  %v2073_v36 = vpop.f32.mrb[27].mxu1 }
 0x8e4   : > { %v1526_v37 = vpack.c.bf16 %v1525_v35, %v1525_v35 }
 0x8e6   : > { %2083 = vmatmul.mubr.msk.bf16.vlgmr.msra.gmra.mrb[20].mxu0 %vm1566_vm6, %v1526_v37 }
 0x9b9   : > { %v1604_v39 = vpop.f32.mrb[20].mxu0 }
 0x9ba   : > { %v1605_v40 = vadd.f32 %v1949_v38, %v1604_v39  ;;  %v2084_v41 = vpop.f32.mrb[21].mxu0 }
 0x9bb   : > { %v1607_v42 = vpop.f32.mrb[22].mxu0 }
 0x9bc   : > { %v1610_v43 = vadd.f32 %v1605_v40, %v1457_v26  ;;  %v2085_v44 = vpop.f32.mrb[23].mxu0 }
 0x9be   : > { %v1613_v0 = vsel %vm788_vm1, %v1610_v43, 0.0  ;;  %v1617_v45 = vmul.f32 %v1610_v43, %v1610_v43 }
 0x9bf   : > { %1614 = vadd.xlane.f32.xlu0 %v1613_v0 }
 0x9c0   : > { %v1618_v46 = vsel %vm788_vm1, %v1617_v45, 0.0 }
 0x9c1   : > { %1619 = vadd.xlane.f32.xlu1 %v1618_v46 }
 0xa4c   : > { %v1615_v47 = vpop.xlane.xlu0 %1614 }
 0xa4d   : > { %v1616_v48 = vmul.f32 0.03125, %v1615_v47 }
 0xa4e   : > { %v1620_v49 = vpop.xlane.xlu1 %1619 }
 0xa4f   : > { %v1622_v50 = vmul.f32 %v1616_v48, %v1616_v48  ;;  %v1621_v51 = vmul.f32 0.03125, %v1620_v49  ;;  %v1625_v55 = vsub.f32 %v1610_v43, %v1616_v48 }
 0xa51   : > { %v1623_v52 = vsub.f32 %v1621_v51, %v1622_v50 }
 0xa53   : > { %v1624_v53 = vmax.f32 %v1623_v52, 0.0 }
 0xa55   : > { %v1626_v54 = vadd.f32 1e-05, %v1624_v53 }
 0xa57   : > { %2319 = vrsqrt.f32 %v1626_v54 }
 0xa61   : > { %v2320_v56 = vpop.eup %2319 }
 0xa62   : > { %v1628_v58 = vmul.f32 %v2320_v56, %v1625_v55 }
 0xa64   : > { %v1635_v60 = vmul.f32 %v1955_v57, %v1628_v58 }
 0xa66   : > { %v1642_v61 = vadd.f32 %v1956_v59, %v1635_v60 }
 0xa68   : > { %1643 = vst.msk [vmem:[%s758_s6] sm:$0xff] %vm788_vm1, %v1642_v61 }
 0xa69   : > { %2786 = shalt.err (!%p2783_p10)
}
 0xa6a   : > { %s2787_s20 = scalar_lea.hbm %s3581_s27, 128  ;;  %s2791_s2 = scalar_lea.hbm %s3717_s7, 256 }
 0xa6b   : > { %p2788_p5 = scmp.ne.s32.totalorder %s3581_s27, %s2787_s20  ;;  %p2792_p6 = scmp.lt.u32.totalorder %s3581_s27, %s3717_s7 }
 0xa6c   : > { %p2793_p11 = scmp.lt.u32.totalorder %s2791_s2, %s2787_s20  ;;  %p2795_p9 = scmp.lt.u32.totalorder %s2787_s20, %s3581_s27 }
 0xa6d   : > { %p2789_p7 = pnand %p2788_p5, %p3718_p12 }
 0xa6e   : > { %p2794_p8 = por %p2793_p11, %p2792_p6 }
 0xa6f   : > { %p2790_p0 = pneg %p2789_p7 }
 0xa70   : > { %p2796_p13 = por %p2795_p9, %p2794_p8 }
 0xa72   : > { %p2797_p1 = pnand %p2796_p13, %p2790_p0 }
 0xa74   : > { %2800 = shalt.err (!%p2797_p1)
}
 0xa75   : > { %2146 = dma.vmem_to_hbm [thread:$0]  (%p3718_p12), %s3583_s16, 128, %s3581_s27, %s1645_s17  }
 0xa76 PF: > { %s3719_s6 = sld [smem:[#allocation40_spill]]  ;;  %p3720_p3 = scmp.ne.s32.totalorder %s3692_s23, 0 }
 0xa77   : > { %p3721_p2 = scmp.ge.s32.totalorder %s2875_s24, 2 }
 0xa79   : > { %p2199_p4 = pnand %p3721_p2, %p3720_p3 }
 0xa7c   : > { %s1670_s22 = sand.u32 1, %s3719_s6  }
 0xa7d   : > { %s1671_s1 = scalar_lea.sflag [#allocation4], %s1670_s22 }
 0xa7e   : > { %2858 = dma.done.wait (!%p2199_p4), %s1671_s1, 128  }
 0xa7f   : > { %2860 = vsyncadd (!%p2199_p4), %s1671_s1, 4294967168  ;;  %s3722_s21 = sld [smem:[#allocation41_spill]]  ;;  %s3723_s22 = sld [smem:[#allocation42_spill]] }
 0xa80   : > { %p39_p10 = scmp.ge.s32.totalorder %s3327_s0, 4   ;;  %s3724_s23 = smov %s3338_s28 }
 0xa81   : > { %s3725_s24 = smov %s3327_s0 }
 0xa82   :  { %41 = sbr.rel (!%p39_p10) target bundleno = 25 (0x19), region = 198 }
 0xa89   :  { %1676 = vsyncpa [#allocation3], 1 }
 0xa8a   :  { %1678 = vsyncpa [#allocation3 + $0x1], 1 }
 0xa8b   :  { %1679 = vsyncpa [#allocation6], 1 }
 0xa8c   :  { %1681 = vsyncpa [#allocation6 + $0x1], 1 }
 0xa8d   :  { %1682 = vsyncpa [#allocation9], 1 }
 0xa8e   :  { %1683 = vsyncpa [#allocation12], 1 }
 0xa8f   :  { %1684 = vsyncpa [#allocation15], 1 }
 0xa90   :  { %1685 = vsyncpa [#allocation18], 1 }
 0xa91   :  { %1686 = vsyncpa [#allocation21], 1 }
 0xa92   :  { %1687 = vsyncpa [#allocation24], 1 }
 0xa93   :  { %1688 = vsyncpa [#allocation27], 1 }
 0xa94   :  { %1689 = vsyncpa [#allocation4], 1 }
 0xa95   :  { %1691 = vsyncpa [#allocation4 + $0x1], 1 }

</bundles_post_ra>
